<compile_context>
chip_gen: v5e
topology: v5e:2x2
jax: 0.10.0
libtpu: 0.0.40
codegen_flags: <defaults>
</compile_context>

<pallas_src>
import functools

import jax
import jax.numpy as jnp
import numpy as np
from jax.experimental import pallas as pl
from jax.experimental.pallas import tpu as pltpu

HIDDEN = 50      # nn.GRU(hidden_size=50)
HP = 64          # lane-aligned padded hidden size (gate blocks HP wide)


def bidir_gru_kernel(S, B,
                     xp_ref, wih_ref, bi_ref, whh_ref, bhn_ref,
                     b1_ref, w2_ref, b2_ref, w1_hbm,
                     o_ref,
                     w1_buf, dma_sem):
    """Single-grid-point kernel; small operands are VMEM resident.

    xp_ref : (S*B, 2E)   bf16 paired input rows [x[t,b] | x[S-1-t,b]]
    wih_ref: (2E, 6HP)   bf16 packed input weights (zero cross-direction blocks)
    bi_ref : (1, 6HP)    f32  b_ih (all gates) + b_hh (r,z), pre-folded
    whh_ref: (2HP, 6HP)  bf16 block-diagonal hidden weights, both directions
    bhn_ref: (1, 2HP)    f32  b_hh of the n gate (stays inside the r*(.) term)
    b1/w2/b2             MLP head (small, auto-VMEM)
    w1_hbm : (2HP, 128)  bf16 fc1 weight left in HBM; fetched via manual DMA
    o_ref  : (B, 1)      f32  sigmoid output
    w1_buf : (2HP, 128)  bf16 VMEM landing buffer for w1
    dma_sem: DMA semaphore for the w1 copy
    """
    HP2, HP4 = 2 * HP, 4 * HP

    # Kick off the head-weight DMA now; it hides under projection + recurrence.
    w1_cp = pltpu.make_async_copy(w1_hbm, w1_buf, dma_sem.at[0])
    w1_cp.start()

    # --- Hoisted input projection: one bf16 MXU op for all steps/dirs/gates,
    # f32 accumulation, result kept in vregs (~6 vregs). ---
    gi = (jnp.dot(xp_ref[...], wih_ref[...], preferred_element_type=jnp.float32)
          + bi_ref[...])                                        # (S*B, 6HP) f32

    # Loop-invariant hidden weights and hoisted (1,2HP)->(B,2HP) bias broadcast.
    whh = whh_ref[...]                                          # bf16
    bhn = jnp.broadcast_to(bhn_ref[...], (B, HP2))              # f32

    # --- Fully unrolled bidirectional recurrence; h = [h_f | h_b]. ---
    h = jnp.zeros((B, HP2), jnp.float32)
    for t in range(S):                         # S static -> straight-line code
        gi_t = gi[t * B:(t + 1) * B, :]        # static, h-independent slice
        gh = jnp.dot(h.astype(jnp.bfloat16), whh,
                     preferred_element_type=jnp.float32)        # (B, 6HP) f32
        rz = jax.nn.sigmoid(gi_t[:, :HP4] + gh[:, :HP4])        # [r_f r_b z_f z_b]
        r = rz[:, :HP2]
        z = rz[:, HP2:]
        n = jnp.tanh(gi_t[:, HP4:] + r * (gh[:, HP4:] + bhn))   # [n_f n_b]
        h = (1.0 - z) * n + z * h

    # --- MLP head.  torch flatten(permute(h_n)) == [h_f_final | h_b_final]. ---
    # TODO(synk): nn.Dropout(0.2) is inference-mode identity (no mask applied).
    w1_cp.wait()                               # prefetched weight now needed
    z1 = jnp.dot(h.astype(jnp.bfloat16), w1_buf[...],
                 preferred_element_type=jnp.float32) + b1_ref[...]
    z1 = jnp.maximum(z1, 0.0)                                   # ReLU
    z2 = jnp.dot(z1, w2_ref[...], preferred_element_type=jnp.float32) + b2_ref[...]
    o_ref[...] = jax.nn.sigmoid(z2)                             # (B, 1)


def pack_params(p, E, H=HIDDEN, Hp=HP):
    """Repack PyTorch-layout GRU weights into lane-aligned fused operands.

    Gate/direction block (g, d) occupies columns [(2g+d)*Hp, (2g+d+1)*Hp); only
    the first H columns of each block (and the first H rows of each direction's
    hidden block / w1 half) are populated, the padding is exactly zero so the
    padded h columns stay 0 through the recurrence.
    """
    H6 = 6 * Hp
    wih, whh, bih, bhh = p["wih"], p["whh"], p["bih"], p["bhh"]
    wih_pair = jnp.zeros((2 * E, H6), jnp.float32)
    whh_bd = jnp.zeros((2 * Hp, H6), jnp.float32)
    bi = jnp.zeros((1, H6), jnp.float32)
    bhn = jnp.zeros((1, 2 * Hp), jnp.float32)
    for d in range(2):                          # 0 = forward, 1 = backward
        xrow = slice(d * E, (d + 1) * E)        # fwd-x rows | reversed-time-x rows
        hrow = slice(d * Hp, d * Hp + H)        # h_f rows   | h_b rows (real part)
        for g in range(3):                      # 0 = r, 1 = z, 2 = n
            c0 = (2 * g + d) * Hp
            c = slice(c0, c0 + H)
            wih_pair = wih_pair.at[xrow, c].set(wih[d, g])
            whh_bd = whh_bd.at[hrow, c].set(whh[d, g])
            b = bih[d, g, 0]
            if g < 2:                           # fold b_hh of r,z into input bias
                b = b + bhh[d, g, 0]
            bi = bi.at[0, c].set(b)
        bhn = bhn.at[0, d * Hp:d * Hp + H].set(bhh[d, 2, 0])
    # fc1 weight: rows 0:H <- h_f part, rows Hp:Hp+H <- h_b part, rest zero.
    w1p = jnp.zeros((2 * Hp, 128), jnp.float32)
    w1p = w1p.at[0:H, :].set(p["w1"][0:H])
    w1p = w1p.at[Hp:Hp + H, :].set(p["w1"][H:2 * H])
    return dict(
        wih_pair=wih_pair.astype(jnp.bfloat16),
        whh_bd=whh_bd.astype(jnp.bfloat16),
        bi=bi, bhn=bhn,
        w1=w1p.astype(jnp.bfloat16),
        b1=p["b1"], w2=p["w2"], b2=p["b2"])


@jax.jit
def bidir_gru_forward(x, packed):
    B, S, E = x.shape
    x = x.astype(jnp.float32)
    # Few-KB layout plumbing, fused by XLA ahead of the kernel: row (t, b) is
    # [x[t, b] | x[S-1-t, b]] so a single matmul yields both directions'
    # time-aligned input projections.  Cast to bf16 for the MXU.
    x_tm = jnp.transpose(x, (1, 0, 2))                      # (S, B, E)
    x_pair = jnp.concatenate([x_tm, x_tm[::-1]], axis=-1)   # (S, B, 2E)
    x_pair = x_pair.reshape(S * B, 2 * E).astype(jnp.bfloat16)

    kernel = functools.partial(bidir_gru_kernel, S, B)
    vmem = pl.BlockSpec(memory_space=pltpu.MemorySpace.VMEM)
    anyspace = pl.BlockSpec(memory_space=pl.ANY)
    return pl.pallas_call(
        kernel,
        out_shape=jax.ShapeDtypeStruct((B, 1), jnp.float32),
        in_specs=[vmem] * 8 + [anyspace],
        out_specs=vmem,
        scratch_shapes=[
            pltpu.VMEM((2 * HP, 128), jnp.bfloat16),   # w1 landing buffer
            pltpu.SemaphoreType.DMA((1,)),             # w1 copy semaphore
        ],
    )(x_pair, packed["wih_pair"], packed["bi"], packed["whh_bd"], packed["bhn"],
      packed["b1"], packed["w2"], packed["b2"], packed["w1"])


def init_params(key, embedding_size, H=HIDDEN):
    """Deterministic synthetic weights, PyTorch-style uniform init scales."""
    ks = jax.random.split(key, 8)
    kg = 1.0 / np.sqrt(H)
    wih = jax.random.uniform(ks[0], (2, 3, embedding_size, H), jnp.float32, -kg, kg)
    whh = jax.random.uniform(ks[1], (2, 3, H, H), jnp.float32, -kg, kg)
    bih = jax.random.uniform(ks[2], (2, 3, 1, H), jnp.float32, -kg, kg)
    bhh = jax.random.uniform(ks[3], (2, 3, 1, H), jnp.float32, -kg, kg)
    k1 = 1.0 / np.sqrt(2 * H)
    w1 = jax.random.uniform(ks[4], (2 * H, 128), jnp.float32, -k1, k1)
    b1 = jax.random.uniform(ks[5], (1, 128), jnp.float32, -k1, k1)
    k2 = 1.0 / np.sqrt(128)
    w2 = jax.random.uniform(ks[6], (128, 1), jnp.float32, -k2, k2)
    b2 = jax.random.uniform(ks[7], (1, 1), jnp.float32, -k2, k2)
    return dict(wih=wih, whh=whh, bih=bih, bhh=bhh, w1=w1, b1=b1, w2=w2, b2=b2)


def reference_forward(x, p):
    """Pure-JAX f32 reference matching PyTorch semantics, for validation."""
    B, S, E = x.shape
    H = HIDDEN

    def gru_dir(d, xs):
        def step(h, x_t):
            gi = [x_t @ p["wih"][d, g] + p["bih"][d, g] for g in range(3)]
            gh = [h @ p["whh"][d, g] + p["bhh"][d, g] for g in range(3)]
            r = jax.nn.sigmoid(gi[0] + gh[0])
            z = jax.nn.sigmoid(gi[1] + gh[1])
            n = jnp.tanh(gi[2] + r * gh[2])
            return (1.0 - z) * n + z * h, None

        h, _ = jax.lax.scan(step, jnp.zeros((B, H), jnp.float32), xs)
        return h

    x_tm = jnp.transpose(x, (1, 0, 2))
    h_f = gru_dir(0, x_tm)
    h_b = gru_dir(1, x_tm[::-1])
    feat = jnp.concatenate([h_f, h_b], axis=-1)
    z1 = jnp.maximum(feat @ p["w1"] + p["b1"], 0.0)
    return jax.nn.sigmoid(z1 @ p["w2"] + p["b2"])


if __name__ == "__main__":
    batch, seq, emb = 2, 8, 32
    key = jax.random.PRNGKey(0)
    k_x, k_p = jax.random.split(key)
    x = jax.random.normal(k_x, (batch, seq, emb), jnp.float32)
    params = init_params(k_p, emb)
    packed = pack_params(params, emb)

    out = jax.block_until_ready(bidir_gru_forward(x, packed))
    ref = jax.block_until_ready(reference_forward(x, params))
    assert out.shape == (batch, 1), out.shape
    # bf16 MXU operands (f32 accumulation / f32 gate math) vs. the f32
    # reference -> tolerance relaxed from 1e-4 to 2e-2 per the review.
    assert np.allclose(np.asarray(out), np.asarray(ref), atol=2e-2, rtol=2e-2), (
        np.asarray(out), np.asarray(ref))
    print("KERNEL_OK")
</pallas_src>

<mosaic_0001>
module attributes {stable_mosaic.version = 11 : i64} {
  func.func @bidir_gru_kernel(%arg0: memref<16x64xbf16, #tpu.memory_space<vmem>>, %arg1: memref<64x384xbf16, #tpu.memory_space<vmem>>, %arg2: memref<1x384xf32, #tpu.memory_space<vmem>>, %arg3: memref<128x384xbf16, #tpu.memory_space<vmem>>, %arg4: memref<1x128xf32, #tpu.memory_space<vmem>>, %arg5: memref<1x128xf32, #tpu.memory_space<vmem>>, %arg6: memref<128x1xf32, #tpu.memory_space<vmem>>, %arg7: memref<1x1xf32, #tpu.memory_space<vmem>>, %arg8: memref<128x128xbf16, #tpu.memory_space<any>>, %arg9: memref<2x1xf32, #tpu.memory_space<vmem>>, %arg10: memref<128x128xbf16, #tpu.memory_space<vmem>>, %arg11: memref<1x!tpu.dma_semaphore, #tpu.memory_space<semaphore_mem>>) attributes {dimension_semantics = [], scalar_prefetch = 0 : i64, scratch_operands = 2 : i64, tpu.core_type = #tpu.core_type<tc>} {
    %c0_i32 = arith.constant 0 : i32
    %0 = tpu.memref_slice %arg11[%c0_i32] : memref<1x!tpu.dma_semaphore, #tpu.memory_space<semaphore_mem>> -> memref<1x!tpu.dma_semaphore, #tpu.memory_space<semaphore_mem>>
    %1 = tpu.memref_squeeze %0 : memref<1x!tpu.dma_semaphore, #tpu.memory_space<semaphore_mem>> -> memref<!tpu.dma_semaphore, #tpu.memory_space<semaphore_mem>>
    tpu.enqueue_dma source(%arg8 : memref<128x128xbf16, #tpu.memory_space<any>>) target(%arg10 : memref<128x128xbf16, #tpu.memory_space<vmem>>) target_semaphore(%1 : memref<!tpu.dma_semaphore, #tpu.memory_space<semaphore_mem>>)
    %c0 = arith.constant 0 : index
    %c0_0 = arith.constant 0 : index
    %2 = vector.load %arg0[%c0, %c0_0] : memref<16x64xbf16, #tpu.memory_space<vmem>>, vector<16x64xbf16>
    %c0_1 = arith.constant 0 : index
    %c0_2 = arith.constant 0 : index
    %3 = vector.load %arg1[%c0_1, %c0_2] : memref<64x384xbf16, #tpu.memory_space<vmem>>, vector<64x384xbf16>
    %cst = arith.constant dense<0.000000e+00> : vector<16x384xf32>
    %4 = tpu.matmul %2, %3, %cst {dimension_numbers = #tpu.dot_dimension_numbers<[1], [0], [0], [1], [0, 0, 1, 1], [], []>} : vector<16x64xbf16>, vector<64x384xbf16>, vector<16x384xf32> -> vector<16x384xf32>
    %c0_3 = arith.constant 0 : index
    %c0_4 = arith.constant 0 : index
    %5 = vector.load %arg2[%c0_3, %c0_4] : memref<1x384xf32, #tpu.memory_space<vmem>>, vector<1x384xf32>
    %6 = vector.broadcast %5 : vector<1x384xf32> to vector<16x384xf32>
    %7 = arith.addf %4, %6 : vector<16x384xf32>
    %c0_5 = arith.constant 0 : index
    %c0_6 = arith.constant 0 : index
    %8 = vector.load %arg3[%c0_5, %c0_6] : memref<128x384xbf16, #tpu.memory_space<vmem>>, vector<128x384xbf16>
    %c0_7 = arith.constant 0 : index
    %c0_8 = arith.constant 0 : index
    %9 = vector.load %arg4[%c0_7, %c0_8] : memref<1x128xf32, #tpu.memory_space<vmem>>, vector<1x128xf32>
    %10 = vector.shape_cast %9 : vector<1x128xf32> to vector<1x128xf32>
    %11 = vector.broadcast %10 : vector<1x128xf32> to vector<2x128xf32>
    %cst_9 = arith.constant 0.000000e+00 : f32
    %12 = vector.broadcast %cst_9 : f32 to vector<2x128xf32>
    %13 = vector.extract_strided_slice %7 {offsets = [0, 0], sizes = [2, 384], strides = [1, 1]} : vector<16x384xf32> to vector<2x384xf32>
    %14 = arith.truncf %12 : vector<2x128xf32> to vector<2x128xbf16>
    %cst_10 = arith.constant dense<0.000000e+00> : vector<2x384xf32>
    %15 = tpu.matmul %14, %8, %cst_10 {dimension_numbers = #tpu.dot_dimension_numbers<[1], [0], [0], [1], [0, 0, 1, 1], [], []>} : vector<2x128xbf16>, vector<128x384xbf16>, vector<2x384xf32> -> vector<2x384xf32>
    %16 = vector.extract_strided_slice %13 {offsets = [0, 0], sizes = [2, 256], strides = [1, 1]} : vector<2x384xf32> to vector<2x256xf32>
    %17 = vector.extract_strided_slice %15 {offsets = [0, 0], sizes = [2, 256], strides = [1, 1]} : vector<2x384xf32> to vector<2x256xf32>
    %18 = arith.addf %16, %17 : vector<2x256xf32>
    %19 = arith.negf %18 : vector<2x256xf32>
    %20 = math.exp %19 : vector<2x256xf32>
    %cst_11 = arith.constant 1.000000e+00 : f32
    %21 = vector.broadcast %cst_11 : f32 to vector<2x256xf32>
    %22 = arith.addf %21, %20 : vector<2x256xf32>
    %23 = arith.divf %21, %22 : vector<2x256xf32>
    %24 = vector.extract_strided_slice %23 {offsets = [0, 0], sizes = [2, 128], strides = [1, 1]} : vector<2x256xf32> to vector<2x128xf32>
    %25 = vector.extract_strided_slice %23 {offsets = [0, 128], sizes = [2, 128], strides = [1, 1]} : vector<2x256xf32> to vector<2x128xf32>
    %26 = vector.extract_strided_slice %13 {offsets = [0, 256], sizes = [2, 128], strides = [1, 1]} : vector<2x384xf32> to vector<2x128xf32>
    %27 = vector.extract_strided_slice %15 {offsets = [0, 256], sizes = [2, 128], strides = [1, 1]} : vector<2x384xf32> to vector<2x128xf32>
    %28 = arith.addf %27, %11 : vector<2x128xf32>
    %29 = arith.mulf %24, %28 : vector<2x128xf32>
    %30 = arith.addf %26, %29 : vector<2x128xf32>
    %31 = math.tanh %30 : vector<2x128xf32>
    %cst_12 = arith.constant 1.000000e+00 : f32
    %32 = vector.broadcast %cst_12 : f32 to vector<2x128xf32>
    %33 = arith.subf %32, %25 : vector<2x128xf32>
    %34 = arith.mulf %33, %31 : vector<2x128xf32>
    %35 = arith.mulf %25, %12 : vector<2x128xf32>
    %36 = arith.addf %34, %35 : vector<2x128xf32>
    %37 = vector.extract_strided_slice %7 {offsets = [2, 0], sizes = [2, 384], strides = [1, 1]} : vector<16x384xf32> to vector<2x384xf32>
    %38 = arith.truncf %36 : vector<2x128xf32> to vector<2x128xbf16>
    %cst_13 = arith.constant dense<0.000000e+00> : vector<2x384xf32>
    %39 = tpu.matmul %38, %8, %cst_13 {dimension_numbers = #tpu.dot_dimension_numbers<[1], [0], [0], [1], [0, 0, 1, 1], [], []>} : vector<2x128xbf16>, vector<128x384xbf16>, vector<2x384xf32> -> vector<2x384xf32>
    %40 = vector.extract_strided_slice %37 {offsets = [0, 0], sizes = [2, 256], strides = [1, 1]} : vector<2x384xf32> to vector<2x256xf32>
    %41 = vector.extract_strided_slice %39 {offsets = [0, 0], sizes = [2, 256], strides = [1, 1]} : vector<2x384xf32> to vector<2x256xf32>
    %42 = arith.addf %40, %41 : vector<2x256xf32>
    %43 = arith.negf %42 : vector<2x256xf32>
    %44 = math.exp %43 : vector<2x256xf32>
    %cst_14 = arith.constant 1.000000e+00 : f32
    %45 = vector.broadcast %cst_14 : f32 to vector<2x256xf32>
    %46 = arith.addf %45, %44 : vector<2x256xf32>
    %47 = arith.divf %45, %46 : vector<2x256xf32>
    %48 = vector.extract_strided_slice %47 {offsets = [0, 0], sizes = [2, 128], strides = [1, 1]} : vector<2x256xf32> to vector<2x128xf32>
    %49 = vector.extract_strided_slice %47 {offsets = [0, 128], sizes = [2, 128], strides = [1, 1]} : vector<2x256xf32> to vector<2x128xf32>
    %50 = vector.extract_strided_slice %37 {offsets = [0, 256], sizes = [2, 128], strides = [1, 1]} : vector<2x384xf32> to vector<2x128xf32>
    %51 = vector.extract_strided_slice %39 {offsets = [0, 256], sizes = [2, 128], strides = [1, 1]} : vector<2x384xf32> to vector<2x128xf32>
    %52 = arith.addf %51, %11 : vector<2x128xf32>
    %53 = arith.mulf %48, %52 : vector<2x128xf32>
    %54 = arith.addf %50, %53 : vector<2x128xf32>
    %55 = math.tanh %54 : vector<2x128xf32>
    %cst_15 = arith.constant 1.000000e+00 : f32
    %56 = vector.broadcast %cst_15 : f32 to vector<2x128xf32>
    %57 = arith.subf %56, %49 : vector<2x128xf32>
    %58 = arith.mulf %57, %55 : vector<2x128xf32>
    %59 = arith.mulf %49, %36 : vector<2x128xf32>
    %60 = arith.addf %58, %59 : vector<2x128xf32>
    %61 = vector.extract_strided_slice %7 {offsets = [4, 0], sizes = [2, 384], strides = [1, 1]} : vector<16x384xf32> to vector<2x384xf32>
    %62 = arith.truncf %60 : vector<2x128xf32> to vector<2x128xbf16>
    %cst_16 = arith.constant dense<0.000000e+00> : vector<2x384xf32>
    %63 = tpu.matmul %62, %8, %cst_16 {dimension_numbers = #tpu.dot_dimension_numbers<[1], [0], [0], [1], [0, 0, 1, 1], [], []>} : vector<2x128xbf16>, vector<128x384xbf16>, vector<2x384xf32> -> vector<2x384xf32>
    %64 = vector.extract_strided_slice %61 {offsets = [0, 0], sizes = [2, 256], strides = [1, 1]} : vector<2x384xf32> to vector<2x256xf32>
    %65 = vector.extract_strided_slice %63 {offsets = [0, 0], sizes = [2, 256], strides = [1, 1]} : vector<2x384xf32> to vector<2x256xf32>
    %66 = arith.addf %64, %65 : vector<2x256xf32>
    %67 = arith.negf %66 : vector<2x256xf32>
    %68 = math.exp %67 : vector<2x256xf32>
    %cst_17 = arith.constant 1.000000e+00 : f32
    %69 = vector.broadcast %cst_17 : f32 to vector<2x256xf32>
    %70 = arith.addf %69, %68 : vector<2x256xf32>
    %71 = arith.divf %69, %70 : vector<2x256xf32>
    %72 = vector.extract_strided_slice %71 {offsets = [0, 0], sizes = [2, 128], strides = [1, 1]} : vector<2x256xf32> to vector<2x128xf32>
    %73 = vector.extract_strided_slice %71 {offsets = [0, 128], sizes = [2, 128], strides = [1, 1]} : vector<2x256xf32> to vector<2x128xf32>
    %74 = vector.extract_strided_slice %61 {offsets = [0, 256], sizes = [2, 128], strides = [1, 1]} : vector<2x384xf32> to vector<2x128xf32>
    %75 = vector.extract_strided_slice %63 {offsets = [0, 256], sizes = [2, 128], strides = [1, 1]} : vector<2x384xf32> to vector<2x128xf32>
    %76 = arith.addf %75, %11 : vector<2x128xf32>
    %77 = arith.mulf %72, %76 : vector<2x128xf32>
    %78 = arith.addf %74, %77 : vector<2x128xf32>
    %79 = math.tanh %78 : vector<2x128xf32>
    %cst_18 = arith.constant 1.000000e+00 : f32
    %80 = vector.broadcast %cst_18 : f32 to vector<2x128xf32>
    %81 = arith.subf %80, %73 : vector<2x128xf32>
    %82 = arith.mulf %81, %79 : vector<2x128xf32>
    %83 = arith.mulf %73, %60 : vector<2x128xf32>
    %84 = arith.addf %82, %83 : vector<2x128xf32>
    %85 = vector.extract_strided_slice %7 {offsets = [6, 0], sizes = [2, 384], strides = [1, 1]} : vector<16x384xf32> to vector<2x384xf32>
    %86 = arith.truncf %84 : vector<2x128xf32> to vector<2x128xbf16>
    %cst_19 = arith.constant dense<0.000000e+00> : vector<2x384xf32>
    %87 = tpu.matmul %86, %8, %cst_19 {dimension_numbers = #tpu.dot_dimension_numbers<[1], [0], [0], [1], [0, 0, 1, 1], [], []>} : vector<2x128xbf16>, vector<128x384xbf16>, vector<2x384xf32> -> vector<2x384xf32>
    %88 = vector.extract_strided_slice %85 {offsets = [0, 0], sizes = [2, 256], strides = [1, 1]} : vector<2x384xf32> to vector<2x256xf32>
    %89 = vector.extract_strided_slice %87 {offsets = [0, 0], sizes = [2, 256], strides = [1, 1]} : vector<2x384xf32> to vector<2x256xf32>
    %90 = arith.addf %88, %89 : vector<2x256xf32>
    %91 = arith.negf %90 : vector<2x256xf32>
    %92 = math.exp %91 : vector<2x256xf32>
    %cst_20 = arith.constant 1.000000e+00 : f32
    %93 = vector.broadcast %cst_20 : f32 to vector<2x256xf32>
    %94 = arith.addf %93, %92 : vector<2x256xf32>
    %95 = arith.divf %93, %94 : vector<2x256xf32>
    %96 = vector.extract_strided_slice %95 {offsets = [0, 0], sizes = [2, 128], strides = [1, 1]} : vector<2x256xf32> to vector<2x128xf32>
    %97 = vector.extract_strided_slice %95 {offsets = [0, 128], sizes = [2, 128], strides = [1, 1]} : vector<2x256xf32> to vector<2x128xf32>
    %98 = vector.extract_strided_slice %85 {offsets = [0, 256], sizes = [2, 128], strides = [1, 1]} : vector<2x384xf32> to vector<2x128xf32>
    %99 = vector.extract_strided_slice %87 {offsets = [0, 256], sizes = [2, 128], strides = [1, 1]} : vector<2x384xf32> to vector<2x128xf32>
    %100 = arith.addf %99, %11 : vector<2x128xf32>
    %101 = arith.mulf %96, %100 : vector<2x128xf32>
    %102 = arith.addf %98, %101 : vector<2x128xf32>
    %103 = math.tanh %102 : vector<2x128xf32>
    %cst_21 = arith.constant 1.000000e+00 : f32
    %104 = vector.broadcast %cst_21 : f32 to vector<2x128xf32>
    %105 = arith.subf %104, %97 : vector<2x128xf32>
    %106 = arith.mulf %105, %103 : vector<2x128xf32>
    %107 = arith.mulf %97, %84 : vector<2x128xf32>
    %108 = arith.addf %106, %107 : vector<2x128xf32>
    %109 = vector.extract_strided_slice %7 {offsets = [8, 0], sizes = [2, 384], strides = [1, 1]} : vector<16x384xf32> to vector<2x384xf32>
    %110 = arith.truncf %108 : vector<2x128xf32> to vector<2x128xbf16>
    %cst_22 = arith.constant dense<0.000000e+00> : vector<2x384xf32>
    %111 = tpu.matmul %110, %8, %cst_22 {dimension_numbers = #tpu.dot_dimension_numbers<[1], [0], [0], [1], [0, 0, 1, 1], [], []>} : vector<2x128xbf16>, vector<128x384xbf16>, vector<2x384xf32> -> vector<2x384xf32>
    %112 = vector.extract_strided_slice %109 {offsets = [0, 0], sizes = [2, 256], strides = [1, 1]} : vector<2x384xf32> to vector<2x256xf32>
    %113 = vector.extract_strided_slice %111 {offsets = [0, 0], sizes = [2, 256], strides = [1, 1]} : vector<2x384xf32> to vector<2x256xf32>
    %114 = arith.addf %112, %113 : vector<2x256xf32>
    %115 = arith.negf %114 : vector<2x256xf32>
    %116 = math.exp %115 : vector<2x256xf32>
    %cst_23 = arith.constant 1.000000e+00 : f32
    %117 = vector.broadcast %cst_23 : f32 to vector<2x256xf32>
    %118 = arith.addf %117, %116 : vector<2x256xf32>
    %119 = arith.divf %117, %118 : vector<2x256xf32>
    %120 = vector.extract_strided_slice %119 {offsets = [0, 0], sizes = [2, 128], strides = [1, 1]} : vector<2x256xf32> to vector<2x128xf32>
    %121 = vector.extract_strided_slice %119 {offsets = [0, 128], sizes = [2, 128], strides = [1, 1]} : vector<2x256xf32> to vector<2x128xf32>
    %122 = vector.extract_strided_slice %109 {offsets = [0, 256], sizes = [2, 128], strides = [1, 1]} : vector<2x384xf32> to vector<2x128xf32>
    %123 = vector.extract_strided_slice %111 {offsets = [0, 256], sizes = [2, 128], strides = [1, 1]} : vector<2x384xf32> to vector<2x128xf32>
    %124 = arith.addf %123, %11 : vector<2x128xf32>
    %125 = arith.mulf %120, %124 : vector<2x128xf32>
    %126 = arith.addf %122, %125 : vector<2x128xf32>
    %127 = math.tanh %126 : vector<2x128xf32>
    %cst_24 = arith.constant 1.000000e+00 : f32
    %128 = vector.broadcast %cst_24 : f32 to vector<2x128xf32>
    %129 = arith.subf %128, %121 : vector<2x128xf32>
    %130 = arith.mulf %129, %127 : vector<2x128xf32>
    %131 = arith.mulf %121, %108 : vector<2x128xf32>
    %132 = arith.addf %130, %131 : vector<2x128xf32>
    %133 = vector.extract_strided_slice %7 {offsets = [10, 0], sizes = [2, 384], strides = [1, 1]} : vector<16x384xf32> to vector<2x384xf32>
    %134 = arith.truncf %132 : vector<2x128xf32> to vector<2x128xbf16>
    %cst_25 = arith.constant dense<0.000000e+00> : vector<2x384xf32>
    %135 = tpu.matmul %134, %8, %cst_25 {dimension_numbers = #tpu.dot_dimension_numbers<[1], [0], [0], [1], [0, 0, 1, 1], [], []>} : vector<2x128xbf16>, vector<128x384xbf16>, vector<2x384xf32> -> vector<2x384xf32>
    %136 = vector.extract_strided_slice %133 {offsets = [0, 0], sizes = [2, 256], strides = [1, 1]} : vector<2x384xf32> to vector<2x256xf32>
    %137 = vector.extract_strided_slice %135 {offsets = [0, 0], sizes = [2, 256], strides = [1, 1]} : vector<2x384xf32> to vector<2x256xf32>
    %138 = arith.addf %136, %137 : vector<2x256xf32>
    %139 = arith.negf %138 : vector<2x256xf32>
    %140 = math.exp %139 : vector<2x256xf32>
    %cst_26 = arith.constant 1.000000e+00 : f32
    %141 = vector.broadcast %cst_26 : f32 to vector<2x256xf32>
    %142 = arith.addf %141, %140 : vector<2x256xf32>
    %143 = arith.divf %141, %142 : vector<2x256xf32>
    %144 = vector.extract_strided_slice %143 {offsets = [0, 0], sizes = [2, 128], strides = [1, 1]} : vector<2x256xf32> to vector<2x128xf32>
    %145 = vector.extract_strided_slice %143 {offsets = [0, 128], sizes = [2, 128], strides = [1, 1]} : vector<2x256xf32> to vector<2x128xf32>
    %146 = vector.extract_strided_slice %133 {offsets = [0, 256], sizes = [2, 128], strides = [1, 1]} : vector<2x384xf32> to vector<2x128xf32>
    %147 = vector.extract_strided_slice %135 {offsets = [0, 256], sizes = [2, 128], strides = [1, 1]} : vector<2x384xf32> to vector<2x128xf32>
    %148 = arith.addf %147, %11 : vector<2x128xf32>
    %149 = arith.mulf %144, %148 : vector<2x128xf32>
    %150 = arith.addf %146, %149 : vector<2x128xf32>
    %151 = math.tanh %150 : vector<2x128xf32>
    %cst_27 = arith.constant 1.000000e+00 : f32
    %152 = vector.broadcast %cst_27 : f32 to vector<2x128xf32>
    %153 = arith.subf %152, %145 : vector<2x128xf32>
    %154 = arith.mulf %153, %151 : vector<2x128xf32>
    %155 = arith.mulf %145, %132 : vector<2x128xf32>
    %156 = arith.addf %154, %155 : vector<2x128xf32>
    %157 = vector.extract_strided_slice %7 {offsets = [12, 0], sizes = [2, 384], strides = [1, 1]} : vector<16x384xf32> to vector<2x384xf32>
    %158 = arith.truncf %156 : vector<2x128xf32> to vector<2x128xbf16>
    %cst_28 = arith.constant dense<0.000000e+00> : vector<2x384xf32>
    %159 = tpu.matmul %158, %8, %cst_28 {dimension_numbers = #tpu.dot_dimension_numbers<[1], [0], [0], [1], [0, 0, 1, 1], [], []>} : vector<2x128xbf16>, vector<128x384xbf16>, vector<2x384xf32> -> vector<2x384xf32>
    %160 = vector.extract_strided_slice %157 {offsets = [0, 0], sizes = [2, 256], strides = [1, 1]} : vector<2x384xf32> to vector<2x256xf32>
    %161 = vector.extract_strided_slice %159 {offsets = [0, 0], sizes = [2, 256], strides = [1, 1]} : vector<2x384xf32> to vector<2x256xf32>
    %162 = arith.addf %160, %161 : vector<2x256xf32>
    %163 = arith.negf %162 : vector<2x256xf32>
    %164 = math.exp %163 : vector<2x256xf32>
    %cst_29 = arith.constant 1.000000e+00 : f32
    %165 = vector.broadcast %cst_29 : f32 to vector<2x256xf32>
    %166 = arith.addf %165, %164 : vector<2x256xf32>
    %167 = arith.divf %165, %166 : vector<2x256xf32>
    %168 = vector.extract_strided_slice %167 {offsets = [0, 0], sizes = [2, 128], strides = [1, 1]} : vector<2x256xf32> to vector<2x128xf32>
    %169 = vector.extract_strided_slice %167 {offsets = [0, 128], sizes = [2, 128], strides = [1, 1]} : vector<2x256xf32> to vector<2x128xf32>
    %170 = vector.extract_strided_slice %157 {offsets = [0, 256], sizes = [2, 128], strides = [1, 1]} : vector<2x384xf32> to vector<2x128xf32>
    %171 = vector.extract_strided_slice %159 {offsets = [0, 256], sizes = [2, 128], strides = [1, 1]} : vector<2x384xf32> to vector<2x128xf32>
    %172 = arith.addf %171, %11 : vector<2x128xf32>
    %173 = arith.mulf %168, %172 : vector<2x128xf32>
    %174 = arith.addf %170, %173 : vector<2x128xf32>
    %175 = math.tanh %174 : vector<2x128xf32>
    %cst_30 = arith.constant 1.000000e+00 : f32
    %176 = vector.broadcast %cst_30 : f32 to vector<2x128xf32>
    %177 = arith.subf %176, %169 : vector<2x128xf32>
    %178 = arith.mulf %177, %175 : vector<2x128xf32>
    %179 = arith.mulf %169, %156 : vector<2x128xf32>
    %180 = arith.addf %178, %179 : vector<2x128xf32>
    %181 = vector.extract_strided_slice %7 {offsets = [14, 0], sizes = [2, 384], strides = [1, 1]} : vector<16x384xf32> to vector<2x384xf32>
    %182 = arith.truncf %180 : vector<2x128xf32> to vector<2x128xbf16>
    %cst_31 = arith.constant dense<0.000000e+00> : vector<2x384xf32>
    %183 = tpu.matmul %182, %8, %cst_31 {dimension_numbers = #tpu.dot_dimension_numbers<[1], [0], [0], [1], [0, 0, 1, 1], [], []>} : vector<2x128xbf16>, vector<128x384xbf16>, vector<2x384xf32> -> vector<2x384xf32>
    %184 = vector.extract_strided_slice %181 {offsets = [0, 0], sizes = [2, 256], strides = [1, 1]} : vector<2x384xf32> to vector<2x256xf32>
    %185 = vector.extract_strided_slice %183 {offsets = [0, 0], sizes = [2, 256], strides = [1, 1]} : vector<2x384xf32> to vector<2x256xf32>
    %186 = arith.addf %184, %185 : vector<2x256xf32>
    %187 = arith.negf %186 : vector<2x256xf32>
    %188 = math.exp %187 : vector<2x256xf32>
    %cst_32 = arith.constant 1.000000e+00 : f32
    %189 = vector.broadcast %cst_32 : f32 to vector<2x256xf32>
    %190 = arith.addf %189, %188 : vector<2x256xf32>
    %191 = arith.divf %189, %190 : vector<2x256xf32>
    %192 = vector.extract_strided_slice %191 {offsets = [0, 0], sizes = [2, 128], strides = [1, 1]} : vector<2x256xf32> to vector<2x128xf32>
    %193 = vector.extract_strided_slice %191 {offsets = [0, 128], sizes = [2, 128], strides = [1, 1]} : vector<2x256xf32> to vector<2x128xf32>
    %194 = vector.extract_strided_slice %181 {offsets = [0, 256], sizes = [2, 128], strides = [1, 1]} : vector<2x384xf32> to vector<2x128xf32>
    %195 = vector.extract_strided_slice %183 {offsets = [0, 256], sizes = [2, 128], strides = [1, 1]} : vector<2x384xf32> to vector<2x128xf32>
    %196 = arith.addf %195, %11 : vector<2x128xf32>
    %197 = arith.mulf %192, %196 : vector<2x128xf32>
    %198 = arith.addf %194, %197 : vector<2x128xf32>
    %199 = math.tanh %198 : vector<2x128xf32>
    %cst_33 = arith.constant 1.000000e+00 : f32
    %200 = vector.broadcast %cst_33 : f32 to vector<2x128xf32>
    %201 = arith.subf %200, %193 : vector<2x128xf32>
    %202 = arith.mulf %201, %199 : vector<2x128xf32>
    %203 = arith.mulf %193, %180 : vector<2x128xf32>
    %204 = arith.addf %202, %203 : vector<2x128xf32>
    %c0_i32_34 = arith.constant 0 : i32
    %205 = tpu.memref_slice %arg11[%c0_i32_34] : memref<1x!tpu.dma_semaphore, #tpu.memory_space<semaphore_mem>> -> memref<1x!tpu.dma_semaphore, #tpu.memory_space<semaphore_mem>>
    %206 = tpu.memref_squeeze %205 : memref<1x!tpu.dma_semaphore, #tpu.memory_space<semaphore_mem>> -> memref<!tpu.dma_semaphore, #tpu.memory_space<semaphore_mem>>
    tpu.wait_dma2 semaphore(%206 : memref<!tpu.dma_semaphore, #tpu.memory_space<semaphore_mem>>) src(%arg8 : memref<128x128xbf16, #tpu.memory_space<any>>) dst(%arg10 : memref<128x128xbf16, #tpu.memory_space<vmem>>)
    %207 = arith.truncf %204 : vector<2x128xf32> to vector<2x128xbf16>
    %c0_35 = arith.constant 0 : index
    %c0_36 = arith.constant 0 : index
    %208 = vector.load %arg10[%c0_35, %c0_36] : memref<128x128xbf16, #tpu.memory_space<vmem>>, vector<128x128xbf16>
    %cst_37 = arith.constant dense<0.000000e+00> : vector<2x128xf32>
    %209 = tpu.matmul %207, %208, %cst_37 {dimension_numbers = #tpu.dot_dimension_numbers<[1], [0], [0], [1], [0, 0, 1, 1], [], []>} : vector<2x128xbf16>, vector<128x128xbf16>, vector<2x128xf32> -> vector<2x128xf32>
    %c0_38 = arith.constant 0 : index
    %c0_39 = arith.constant 0 : index
    %210 = vector.load %arg5[%c0_38, %c0_39] : memref<1x128xf32, #tpu.memory_space<vmem>>, vector<1x128xf32>
    %211 = vector.broadcast %210 : vector<1x128xf32> to vector<2x128xf32>
    %212 = arith.addf %209, %211 : vector<2x128xf32>
    %cst_40 = arith.constant 0.000000e+00 : f32
    %213 = vector.broadcast %cst_40 : f32 to vector<2x128xf32>
    %214 = arith.maximumf %212, %213 : vector<2x128xf32>
    %c0_41 = arith.constant 0 : index
    %c0_42 = arith.constant 0 : index
    %215 = vector.load %arg6[%c0_41, %c0_42] : memref<128x1xf32, #tpu.memory_space<vmem>>, vector<128x1xf32>
    %cst_43 = arith.constant dense<0.000000e+00> : vector<2x1xf32>
    %216 = tpu.matmul %214, %215, %cst_43 {dimension_numbers = #tpu.dot_dimension_numbers<[1], [0], [0], [1], [0, 0, 1, 1], [], []>} : vector<2x128xf32>, vector<128x1xf32>, vector<2x1xf32> -> vector<2x1xf32>
    %c0_44 = arith.constant 0 : index
    %c0_45 = arith.constant 0 : index
    %217 = vector.load %arg7[%c0_44, %c0_45] : memref<1x1xf32, #tpu.memory_space<vmem>>, vector<1x1xf32>
    %218 = vector.broadcast %217 : vector<1x1xf32> to vector<2x1xf32>
    %219 = arith.addf %216, %218 : vector<2x1xf32>
    %220 = arith.negf %219 : vector<2x1xf32>
    %221 = math.exp %220 : vector<2x1xf32>
    %cst_46 = arith.constant 1.000000e+00 : f32
    %222 = vector.broadcast %cst_46 : f32 to vector<2x1xf32>
    %223 = arith.addf %222, %221 : vector<2x1xf32>
    %224 = arith.divf %222, %223 : vector<2x1xf32>
    %c0_47 = arith.constant 0 : index
    %c0_48 = arith.constant 0 : index
    %225 = vector.load %arg9[%c0_47, %c0_48] : memref<2x1xf32, #tpu.memory_space<vmem>>, vector<2x1xf32>
    tpu.vector_store %arg9[%c0_47, %c0_48], %224 {strides = array<i32>} : memref<2x1xf32, #tpu.memory_space<vmem>>, vector<2x1xf32>,
    return
  }
}

</mosaic_0001>

<bundles_post_ra>
// kernel: bidir_gru_forward.1
= control target key start
LH: loop header
LB: loop body
LE: loop exit
PB: predicated region body
PF: predicated region fallthrough
CT: control target
= control target key end

     0   :  { %s2273_s0 = inlined_call_operand.vmem [shape: bf16[16,64], index: 0, kind: input, shape index: {}]   ;;  %s2274_s1 = inlined_call_operand.vmem [shape: bf16[64,384], index: 1, kind: input, shape index: {}]   ;;  %s2275_s2 = inlined_call_operand.vmem [shape: f32[1,384], index: 2, kind: input, shape index: {}]   ;;  %s2276_s3 = inlined_call_operand.hbm [shape: bf16[128,384], index: 3, kind: input, shape index: {}]   ;;  %s2277_s4 = inlined_call_operand.vmem [shape: f32[1,128], index: 4, kind: input, shape index: {}]   ;;  %s2278_s5 = inlined_call_operand.vmem [shape: f32[1,128], index: 5, kind: input, shape index: {}]   ;;  %s2279_s6 = inlined_call_operand.vmem [shape: f32[128,1], index: 6, kind: input, shape index: {}]   ;;  %s2280_s7 = inlined_call_operand.<no memory space> [shape: f32[1,1], index: 7, kind: input, shape index: {}]   ;;  %s2281_s8 = inlined_call_operand.vmem [shape: bf16[128,128], index: 8, kind: input, shape index: {}]   ;;  %s2282_s9 = inlined_call_operand.vmem [shape: f32[2,1], index: 9, kind: output, shape index: {}]  }
   0x1   :  { %v14_v0 = vstv %s2280_s7 }
   0x2   :  { %15 = vst [vmem:[#allocation4] sm:$0x1] %v14_v0 }
   0x3   :  { %16 = vsyncpa [#allocation6], 0  ;;  %s27_s13 = sshll.u32 %s2276_s3, 4  ;;  %s1711_s14 = smov [#allocation5]   ;;  %s28_s13 = int_to_ptr.hbm [resolvable:$true] %s27_s13 }
   0x4   :  { %s29_s15 = sshll.u32 %s1711_s14, 4  ;;  %s1712_s16 = smov 192   ;;  %s30_s15 = int_to_ptr.vmem [resolvable:$true] %s29_s15 }
   0x5   :  { %s1713_s17 = smov 12  }
   0x6   :  { %35 = dma.hbm_to_vmem [thread:$0]  %s28_s13, 3072, %s30_s15, [#allocation6], %s1712_s16, %s1712_s16, %s1713_s17  }
   0x7   :  { %1707 = dma.done.wait [#allocation6], 3072  }
   0x8   :  { %1708 = vsyncadd [#allocation6], 4294964224  ;;  %v59_v1 = vld [vmem:[%s2281_s8] sm:$0xff]  ;;  %v61_v2 = vld [vmem:[%s2281_s8 + $0x8] sm:$0xff] }
   0x9   :  { %v63_v3 = vld [vmem:[%s2281_s8 + $0x10] sm:$0xff]  ;;  %60 = vst [vmem:[#allocation2 + $0x30] sm:$0xff] %v59_v1  ;;  %v65_v4 = vld [vmem:[%s2281_s8 + $0x18] sm:$0xff]  ;;  %v67_v5 = vld [vmem:[%s2281_s8 + $0x20] sm:$0xff] }
   0xa   :  { %62 = vst [vmem:[#allocation2] sm:$0xff] %v61_v2  ;;  %v69_v6 = vld [vmem:[%s2281_s8 + $0x28] sm:$0xff]  ;;  %v71_v7 = vld [vmem:[%s2281_s8 + $0x30] sm:$0xff]  ;;  %v73_v8 = vld [vmem:[%s2281_s8 + $0x38] sm:$0xff] }
   0xb   :  { %64 = vst [vmem:[#allocation2 + $0x18] sm:$0xff] %v63_v3 }
   0xc   :  { %66 = vst [vmem:[#allocation2 + $0x10] sm:$0xff] %v65_v4 }
   0xd   :  { %68 = vst [vmem:[#allocation2 + $0x8] sm:$0xff] %v67_v5 }
   0xe   :  { %70 = vst [vmem:[#allocation2 + $0x20] sm:$0xff] %v69_v6 }
   0xf   :  { %72 = vst [vmem:[#allocation2 + $0x28] sm:$0xff] %v71_v7 }
  0x10   :  { %74 = vst [vmem:[#allocation2 + $0x38] sm:$0xff] %v73_v8 }
  0x11   :  { %80 = vsyncadd [#allocation3], 1024  ;;  %v1387_v9 = vld [vmem:[%s2274_s1 + $0x48] sm:$0xf]  ;;  %v1557_v10 = vld [vmem:[%s2274_s1 + $0x50] sm:$0xf0] }
  0x12   :  { %v1388_v11 = vor.u32 %v1557_v10, %v1387_v9  ;;  %v1486_v12 = vld [vmem:[#allocation5 + $0xa8] sm:$0xf]  ;;  %v1581_v13 = vld [vmem:[#allocation5 + $0xb0] sm:$0xf0]  ;;  %v1580_v14 = vld [vmem:[#allocation5 + $0xac] sm:$0xf] }
  0x13   :  { %v1801_v15 = vor.u32 %v1581_v13, %v1486_v12  ;;  %v1488_v16 = vld [vmem:[#allocation5 + $0xb4] sm:$0xf0]  ;;  %v1375_v17 = vld [vmem:[%s2274_s1 + $0x30] sm:$0xf]  ;;  %v1578_v22 = vld [vmem:[#allocation5 + $0x98] sm:$0xf0] }
  0x14   :  { %v1554_v18 = vld [vmem:[%s2274_s1 + $0x38] sm:$0xf0]  ;;  %184 = vmatpush.bf16.msra.mxu1 %v1388_v11  ;;  %v1809_v19 = vor.u32 %v1580_v14, %v1488_v16  ;;  %v1474_v21 = vld [vmem:[#allocation5 + $0x90] sm:$0xf]  ;;  %v1577_v23 = vld [vmem:[#allocation5 + $0x94] sm:$0xf] }
  0x15   :  { %v1376_v20 = vor.u32 %v1554_v18, %v1375_v17  ;;  %386 = vmatpush.bf16.msra.mxu3 %v1801_v15  ;;  %v1812_v24 = vor.u32 %v1578_v22, %v1474_v21  ;;  %v1476_v25 = vld [vmem:[#allocation5 + $0x9c] sm:$0xf0]  ;;  %v1363_v26 = vld [vmem:[%s2274_s1 + $0x18] sm:$0xf]  ;;  %v1575_v30 = vld [vmem:[#allocation5 + $0x80] sm:$0xf0] }
  0x16   :  { %v1551_v27 = vld [vmem:[%s2274_s1 + $0x20] sm:$0xf0]  ;;  %399 = vmatpush.bf16.msra.mxu0 %v1809_v19  ;;  %v1821_v28 = vor.u32 %v1577_v23, %v1476_v25  ;;  %v1462_v29 = vld [vmem:[#allocation5 + $0x78] sm:$0xf]  ;;  %v1574_v31 = vld [vmem:[#allocation5 + $0x7c] sm:$0xf] }
  0x17   :  { %v1464_v32 = vld [vmem:[#allocation5 + $0x84] sm:$0xf0]  ;;  %v1364_v33 = vor.u32 %v1551_v27, %v1363_v26  ;;  %v1824_v34 = vor.u32 %v1575_v30, %v1462_v29  ;;  %v1351_v35 = vld [vmem:[%s2274_s1] sm:$0xf]  ;;  %v1572_v39 = vld [vmem:[#allocation5 + $0x68] sm:$0xf0] }
  0x18   :  { %185 = vmatpush.bf16.msra.mxu1 %v1376_v20  ;;  %v1548_v36 = vld [vmem:[%s2274_s1 + $0x8] sm:$0xf0]  ;;  %v1450_v37 = vld [vmem:[#allocation5 + $0x60] sm:$0xf]  ;;  %v1833_v38 = vor.u32 %v1574_v31, %v1464_v32  ;;  %v1389_v41 = vld [vmem:[%s2274_s1 + $0x54] sm:$0xf0] }
  0x19   :  { %387 = vmatpush.bf16.msra.mxu3 %v1812_v24  ;;  %v1556_v40 = vld [vmem:[%s2274_s1 + $0x4c] sm:$0xf]  ;;  %v1571_v42 = vld [vmem:[#allocation5 + $0x64] sm:$0xf]  ;;  %v1452_v43 = vld [vmem:[#allocation5 + $0x6c] sm:$0xf0]  ;;  %v1352_v44 = vor.u32 %v1548_v36, %v1351_v35  ;;  %v1842_v45 = vor.u32 %v1572_v39, %v1450_v37 }
  0x1a   :  { %400 = vmatpush.bf16.msra.mxu0 %v1821_v28  ;;  %v1392_v46 = vor.u32 %v1556_v40, %v1389_v41  ;;  %v1438_v47 = vld [vmem:[#allocation5 + $0x48] sm:$0xf]  ;;  %v1845_v48 = vor.u32 %v1571_v42, %v1452_v43  ;;  %v1569_v49 = vld [vmem:[#allocation5 + $0x50] sm:$0xf0]  ;;  %v1377_v51 = vld [vmem:[%s2274_s1 + $0x3c] sm:$0xf0] }
  0x1b   :  { %v1553_v50 = vld [vmem:[%s2274_s1 + $0x34] sm:$0xf]  ;;  %v1856_v52 = vld [vmem:[%s2273_s0] sm:$0xff]  ;;  %v1568_v53 = vld [vmem:[#allocation5 + $0x4c] sm:$0xf]  ;;  %vm176_vm0 = vcmask 523264   ;;  %v1859_v55 = vor.u32 %v1569_v49, %v1438_v47 }
  0x1c   :  { %186 = vmatpush.bf16.msra.mxu1 %v1364_v33  ;;  %v1440_v54 = vld [vmem:[#allocation5 + $0x54] sm:$0xf0]  ;;  %v1380_v56 = vor.u32 %v1553_v50, %v1377_v51  ;;  %v1426_v57 = vld [vmem:[#allocation5 + $0x30] sm:$0xf]  ;;  %v1566_v59 = vld [vmem:[#allocation5 + $0x38] sm:$0xf0] }
  0x1d   :  { %388 = vmatpush.bf16.msra.mxu3 %v1824_v34  ;;  %v1862_v58 = vor.u32 %v1568_v53, %v1440_v54  ;;  %v1550_v60 = vld [vmem:[%s2274_s1 + $0x1c] sm:$0xf]  ;;  %v1365_v61 = vld [vmem:[%s2274_s1 + $0x24] sm:$0xf0]  ;;  %v1565_v62 = vld [vmem:[#allocation5 + $0x34] sm:$0xf]  ;;  %v1879_v3 = vor.u32 %v1566_v59, %v1426_v57 }
  0x1e   :  { %401 = vmatpush.bf16.msra.mxu0 %v1833_v38  ;;  %v1428_v63 = vld [vmem:[#allocation5 + $0x3c] sm:$0xf0]  ;;  %v1414_v0 = vld [vmem:[#allocation5 + $0x18] sm:$0xf]  ;;  %v1395_v1 = vld [vmem:[%s2274_s1 + $0x50] sm:$0xf]  ;;  %v1368_v4 = vor.u32 %v1550_v60, %v1365_v61 }
  0x1f   :  { %v1558_v2 = vld [vmem:[%s2274_s1 + $0x58] sm:$0xf0]  ;;  %v1563_v5 = vld [vmem:[#allocation5 + $0x20] sm:$0xf0]  ;;  %v1383_v7 = vld [vmem:[%s2274_s1 + $0x38] sm:$0xf]  ;;  %v1888_v9 = vor.u32 %v1565_v62, %v1428_v63 }
  0x20   :  { %187 = vmatpush.bf16.msra.mxu1 %v1352_v44  ;;  %v1396_v6 = vor.u32 %v1558_v2, %v1395_v1  ;;  %v1555_v8 = vld [vmem:[%s2274_s1 + $0x40] sm:$0xf0]  ;;  %v1353_v11 = vld [vmem:[%s2274_s1 + $0xc] sm:$0xf0]  ;;  %v1562_v12 = vld [vmem:[#allocation5 + $0x1c] sm:$0xf]  ;;  %v1903_v21 = vor.u32 %v1563_v5, %v1414_v0 }
  0x21   :  { %389 = vmatpush.bf16.msra.mxu3 %v1842_v45  ;;  %v1547_v10 = vld [vmem:[%s2274_s1 + $0x4] sm:$0xf]  ;;  %v1416_v13 = vld [vmem:[#allocation5 + $0x24] sm:$0xf0]  ;;  %v1494_v14 = vld [vmem:[#allocation5 + $0xb0] sm:$0xf]  ;;  %v1384_v17 = vor.u32 %v1555_v8, %v1383_v7 }
  0x22   :  { %402 = vmatpush.bf16.msra.mxu0 %v1845_v48  ;;  %v1582_v16 = vld [vmem:[#allocation5 + $0xb8] sm:$0xf0]  ;;  %212 = vmatpush.bf16.msra.mxu2 %v1396_v6  ;;  %v1552_v20 = vld [vmem:[%s2274_s1 + $0x28] sm:$0xf0]  ;;  %v1356_v22 = vor.u32 %v1547_v10, %v1353_v11  ;;  %v1402_v23 = vld [vmem:[#allocation5] sm:$0xf]  ;;  %v1906_v25 = vor.u32 %v1562_v12, %v1416_v13 }
  0x23   :  { %1397 = vmatmul.msk.bf16.vlgmr.msra.gmra.mxu1 %vm176_vm0, %v1856_v52  ;;  %v1371_v18 = vld [vmem:[%s2274_s1 + $0x20] sm:$0xf]  ;;  %v1908_v26 = vor.u32 %v1582_v16, %v1494_v14  ;;  %v1560_v27 = vld [vmem:[#allocation5 + $0x8] sm:$0xf0]  ;;  %v1559_v29 = vld [vmem:[#allocation5 + $0x4] sm:$0xf] }
  0x24   :  { %198 = vmatpush.bf16.msrb.mxu1 %v1392_v46  ;;  %v1404_v30 = vld [vmem:[#allocation5 + $0xc] sm:$0xf0]  ;;  %v1482_v31 = vld [vmem:[#allocation5 + $0x98] sm:$0xf]  ;;  %v1579_v32 = vld [vmem:[#allocation5 + $0xa0] sm:$0xf0]  ;;  %v1372_v33 = vor.u32 %v1552_v20, %v1371_v18  ;;  %v1917_v37 = vor.u32 %v1560_v27, %v1402_v23 }
  0x25   :  { %390 = vmatpush.bf16.msra.mxu3 %v1859_v55  ;;  %v1359_v35 = vld [vmem:[%s2274_s1 + $0x8] sm:$0xf]  ;;  %v1549_v36 = vld [vmem:[%s2274_s1 + $0x10] sm:$0xf0]  ;;  %v1921_v39 = vor.u32 %v1559_v29, %v1404_v30  ;;  %v1923_v40 = vor.u32 %v1579_v32, %v1482_v31  ;;  %v1470_v41 = vld [vmem:[#allocation5 + $0x80] sm:$0xf] }
  0x26   :  { %403 = vmatpush.bf16.msra.mxu0 %v1862_v58  ;;  %213 = vmatpush.bf16.msra.mxu2 %v1384_v17  ;;  %v1576_v42 = vld [vmem:[#allocation5 + $0x88] sm:$0xf0]  ;;  %v1360_v43 = vor.u32 %v1549_v36, %v1359_v35  ;;  %v1458_v46 = vld [vmem:[#allocation5 + $0x68] sm:$0xf]  ;;  %v1573_v47 = vld [vmem:[#allocation5 + $0x70] sm:$0xf0] }
  0x27   :  { %v1928_v44 = vor.u32 %v1576_v42, %v1470_v41  ;;  %v1714_v49 = vmov 0   ;;  %v1935_v50 = vor.u32 %v1573_v47, %v1458_v46  ;;  %v1446_v51 = vld [vmem:[#allocation5 + $0x50] sm:$0xf]  ;;  %v1570_v53 = vld [vmem:[#allocation5 + $0x58] sm:$0xf0] }
  0x28   :  { %199 = vmatpush.bf16.msrb.mxu1 %v1380_v56  ;;  %v1943_v54 = vor.u32 %v1570_v53, %v1446_v51  ;;  %v1434_v56 = vld [vmem:[#allocation5 + $0x38] sm:$0xf]  ;;  %v1567_v57 = vld [vmem:[#allocation5 + $0x40] sm:$0xf0]  ;;  %v1422_v59 = vld [vmem:[#allocation5 + $0x20] sm:$0xf] }
  0x29   :  { %391 = vmatpush.bf16.msra.mxu3 %v1879_v3  ;;  %v1564_v60 = vld [vmem:[#allocation5 + $0x28] sm:$0xf0]  ;;  %v1410_v62 = vld [vmem:[#allocation5 + $0x8] sm:$0xf]  ;;  %v1561_v63 = vld [vmem:[#allocation5 + $0x10] sm:$0xf0] }
  0x2a   :  { %404 = vmatpush.bf16.msra.mxu0 %v1888_v9  ;;  %214 = vmatpush.bf16.msra.mxu2 %v1372_v33  ;;  %v1955_v61 = vor.u32 %v1564_v60, %v1422_v59  ;;  %v1961_v0 = vor.u32 %v1561_v63, %v1410_v62  ;;  %v2017_v2 = vld [vmem:[%s2275_s2] sm:$0x7] }
  0x2b   :  { %v102_v7 = vperm.slane %v2017_v2, 1  ;;  %v2034_v46 = vld [vmem:[%s2277_s4] ss:$0 sm:$0xff] }
  0x2c   :  { %200 = vmatpush.bf16.msrb.mxu1 %v1368_v4  ;;  %v101_v4 = vperm.slane %v2017_v2, 0 }
  0x2d   :  { %392 = vmatpush.bf16.msra.mxu3 %v1903_v21 }
  0x2e   :  { %405 = vmatpush.bf16.msra.mxu0 %v1906_v25  ;;  %215 = vmatpush.bf16.msra.mxu2 %v1360_v43 }
  0x30   :  { %201 = vmatpush.bf16.msrb.mxu1 %v1356_v22 }
  0x31   :  { %393 = vmatpush.bf16.msra.mxu3 %v1917_v37  ;;  %1399 = vmatmul.msk.bf16.vlgmr.msra.gmra.mxu2 %vm176_vm0, %v1856_v52 }
  0x32   :  { %406 = vmatpush.bf16.msra.mxu0 %v1921_v39  ;;  %474 = vmatpush.bf16.msrb.mxu2 %v1801_v15 }
  0x33   :  { %1398 = vmatmul.msk.bf16.vlgmr.msrb.gmra.mxu1 %vm176_vm0, %v1856_v52  ;;  %v1949_v52 = vor.u32 %v1567_v57, %v1434_v56  ;;  %v103_v56 = vperm.slane %v2017_v2, 2 }
  0x34   :  { %412 = vmatpush.bf16.msra.mxu1 %v1908_v26  ;;  %394 = vmatmul.bf16.vlgmr.msra.gmra.mxu3 %v1714_v49 }
  0x35   :  { %407 = vmatmul.bf16.vlgmr.msra.gmra.mxu0 %v1714_v49  ;;  %487 = vmatpush.bf16.msrb.mxu3 %v1809_v19 }
  0x36   :  { %500 = vmatpush.bf16.msrb.mxu0 %v1908_v26  ;;  %475 = vmatpush.bf16.msrb.mxu2 %v1812_v24 }
  0x38   :  { %413 = vmatpush.bf16.msra.mxu1 %v1923_v40 }
  0x39   :  { %488 = vmatpush.bf16.msrb.mxu3 %v1821_v28 }
  0x3a   :  { %501 = vmatpush.bf16.msrb.mxu0 %v1923_v40  ;;  %476 = vmatpush.bf16.msrb.mxu2 %v1824_v34 }
  0x3c   :  { %414 = vmatpush.bf16.msra.mxu1 %v1928_v44 }
  0x3d   :  { %489 = vmatpush.bf16.msrb.mxu3 %v1833_v38 }
  0x3e   :  { %502 = vmatpush.bf16.msrb.mxu0 %v1928_v44  ;;  %477 = vmatpush.bf16.msrb.mxu2 %v1842_v45 }
  0x40   :  { %415 = vmatpush.bf16.msra.mxu1 %v1935_v50 }
  0x41   :  { %490 = vmatpush.bf16.msrb.mxu3 %v1845_v48 }
  0x42   :  { %503 = vmatpush.bf16.msrb.mxu0 %v1935_v50  ;;  %478 = vmatpush.bf16.msrb.mxu2 %v1859_v55 }
  0x44   :  { %416 = vmatpush.bf16.msra.mxu1 %v1943_v54 }
  0x45   :  { %491 = vmatpush.bf16.msrb.mxu3 %v1862_v58 }
  0x46   :  { %504 = vmatpush.bf16.msrb.mxu0 %v1943_v54  ;;  %479 = vmatpush.bf16.msrb.mxu2 %v1879_v3 }
  0x48   :  { %417 = vmatpush.bf16.msra.mxu1 %v1949_v52 }
  0x49   :  { %492 = vmatpush.bf16.msrb.mxu3 %v1888_v9 }
  0x4a   :  { %505 = vmatpush.bf16.msrb.mxu0 %v1949_v52  ;;  %480 = vmatpush.bf16.msrb.mxu2 %v1903_v21 }
  0x4c   :  { %418 = vmatpush.bf16.msra.mxu1 %v1955_v61 }
  0x4d   :  { %493 = vmatpush.bf16.msrb.mxu3 %v1906_v25 }
  0x4e   :  { %506 = vmatpush.bf16.msrb.mxu0 %v1955_v61  ;;  %481 = vmatpush.bf16.msrb.mxu2 %v1917_v37 }
  0x50   :  { %419 = vmatpush.bf16.msra.mxu1 %v1961_v0 }
  0x51   :  { %494 = vmatpush.bf16.msrb.mxu3 %v1921_v39 }
  0x52   :  { %590 = vmatpush.bf16.msra.mxu2 %v1809_v19  ;;  %507 = vmatpush.bf16.msrb.mxu0 %v1961_v0 }
  0x53   :  { %420 = vmatmul.bf16.vlgmr.msra.gmra.mxu1 %v1714_v49 }
  0x54   :  { %577 = vmatpush.bf16.msrb.mxu1 %v1801_v15 }
  0x55   :  { %603 = vmatpush.bf16.msra.mxu3 %v1908_v26 }
  0x56   :  { %680 = vmatpush.bf16.msra.mxu0 %v1801_v15  ;;  %591 = vmatpush.bf16.msra.mxu2 %v1821_v28 }
  0x58   :  { %578 = vmatpush.bf16.msrb.mxu1 %v1812_v24 }
  0x59   :  { %604 = vmatpush.bf16.msra.mxu3 %v1923_v40 }
  0x5a   :  { %681 = vmatpush.bf16.msra.mxu0 %v1812_v24  ;;  %592 = vmatpush.bf16.msra.mxu2 %v1833_v38 }
  0x5c   :  { %579 = vmatpush.bf16.msrb.mxu1 %v1824_v34 }
  0x5d   :  { %605 = vmatpush.bf16.msra.mxu3 %v1928_v44 }
  0x5e   :  { %682 = vmatpush.bf16.msra.mxu0 %v1824_v34  ;;  %593 = vmatpush.bf16.msra.mxu2 %v1845_v48 }
  0x60   :  { %580 = vmatpush.bf16.msrb.mxu1 %v1842_v45 }
  0x61   :  { %606 = vmatpush.bf16.msra.mxu3 %v1935_v50 }
  0x62   :  { %683 = vmatpush.bf16.msra.mxu0 %v1842_v45  ;;  %594 = vmatpush.bf16.msra.mxu2 %v1862_v58 }
  0x64   :  { %581 = vmatpush.bf16.msrb.mxu1 %v1859_v55 }
  0x65   :  { %607 = vmatpush.bf16.msra.mxu3 %v1943_v54 }
  0x66   :  { %684 = vmatpush.bf16.msra.mxu0 %v1859_v55  ;;  %595 = vmatpush.bf16.msra.mxu2 %v1888_v9 }
  0x68   :  { %582 = vmatpush.bf16.msrb.mxu1 %v1879_v3 }
  0x69   :  { %608 = vmatpush.bf16.msra.mxu3 %v1949_v52 }
  0x6a   :  { %685 = vmatpush.bf16.msra.mxu0 %v1879_v3  ;;  %596 = vmatpush.bf16.msra.mxu2 %v1906_v25 }
  0x6c   :  { %583 = vmatpush.bf16.msrb.mxu1 %v1903_v21 }
  0x6d   :  { %609 = vmatpush.bf16.msra.mxu3 %v1955_v61 }
  0x6e   :  { %686 = vmatpush.bf16.msra.mxu0 %v1903_v21  ;;  %597 = vmatpush.bf16.msra.mxu2 %v1921_v39 }
  0x70   :  { %584 = vmatpush.bf16.msrb.mxu1 %v1917_v37 }
  0x71   :  { %610 = vmatpush.bf16.msra.mxu3 %v1961_v0 }
  0x72   :  { %687 = vmatpush.bf16.msra.mxu0 %v1917_v37 }
  0x74   :  { %693 = vmatpush.bf16.msra.mxu1 %v1809_v19 }
  0x78   :  { %694 = vmatpush.bf16.msra.mxu1 %v1821_v28 }
  0x7c   :  { %695 = vmatpush.bf16.msra.mxu1 %v1833_v38 }
  0x80   :  { %696 = vmatpush.bf16.msra.mxu1 %v1845_v48 }
  0x84   :  { %697 = vmatpush.bf16.msra.mxu1 %v1862_v58 }
  0x88   :  { %698 = vmatpush.bf16.msra.mxu1 %v1888_v9 }
  0x8c   :  { %699 = vmatpush.bf16.msra.mxu1 %v1906_v25 }
  0x90   :  { %700 = vmatpush.bf16.msra.mxu1 %v1921_v39 }
  0xa0   :  { %v189_v1 = vpop.f32.mrf.mxu1 }
  0xa1   :  { %v2026_v14 = vadd.f32 %v189_v1, %v101_v4 }
  0xa8   :  { %v191_v5 = vpop.f32.mrf.mxu1 }
  0xa9   :  { %v2020_v6 = vadd.f32 %v191_v5, %v101_v4 }
  0xb0   :  { %v203_v8 = vpop.f32.mrf.mxu1 }
  0xb1   :  { %v2023_v10 = vadd.f32 %v203_v8, %v102_v7 }
  0xb2   :  { %v408_v11 = vpop.f32.mrf.mxu0 }
  0xb3   :  { %v426_v12 = vadd.f32 %v408_v11, %v2023_v10 }
  0xb4   :  { %v217_v1 = vpop.f32.mrf.mxu2 }
  0xb5   :  { %v1497_v13 = vmul.f32 -1.442695, %v426_v12  ;;  %v2040_v5 = vadd.f32 %v217_v1, %v103_v56 }
  0xb7   :  { %1596 = vpow2.f32 %v1497_v13  ;;  %v395_v16 = vpop.f32.mrf.mxu3 }
  0xb8   :  { %v425_v17 = vadd.f32 %v395_v16, %v2026_v14  ;;  %v205_v18 = vpop.f32.mrf.mxu1 }
  0xb9   :  { %v2029_v20 = vadd.f32 %v205_v18, %v102_v7 }
  0xba   :  { %v1496_v22 = vmul.f32 -1.442695, %v425_v17  ;;  %v410_v23 = vpop.f32.mrf.mxu0 }
  0xbc   :  { %1598 = vpow2.f32 %v1496_v22 }
  0xbd   :  { %v1597_v27 = vpop.eup %1596 }
  0xbe   :  { %v434_v29 = vadd.f32 1.0, %v1597_v27 }
  0xbf   :  { %v397_v30 = vpop.f32.mrf.mxu3 }
  0xc0   :  { %1600 = vrcp.f32 %v434_v29  ;;  %vm455_vm4 = vweird.f32 %v434_v29  ;;  %v461_v7 = vand.u32 2147483648, %v434_v29  ;;  %v459_v12 = vand.u32 2147483647, %v434_v29 }
  0xc2   :  { %v1599_v31 = vpop.eup %1598  ;;  %v462_v17 = vor.u32 1.1754944e-38, %v461_v7  ;;  %vm460_vm8 = vcmp.eq.f32.partialorder %v459_v12, 8.507059e+37 }
  0xc3   :  { %v433_v32 = vadd.f32 1.0, %v1599_v31 }
  0xc5   :  { %1602 = vrcp.f32 %v433_v32  ;;  %v446_v49 = vand.u32 2147483648, %v433_v32  ;;  %v444_v53 = vand.u32 2147483647, %v433_v32  ;;  %vm440_vm2 = vweird.f32 %v433_v32 }
  0xc6   :  { %v1601_v33 = vpop.eup %1600 }
  0xc7   :  { %v451_v35 = vmul.f32 %v1601_v33, %v434_v29  ;;  %v447_v63 = vor.u32 1.1754944e-38, %v446_v49  ;;  %vm456_vm5 = vweird.f32 %v1601_v33  ;;  %vm445_vm6 = vcmp.eq.f32.partialorder %v444_v53, 8.507059e+37  ;;  %v2071_v29 = vpop.f32.mrf.mxu2 }
  0xc8   :  { %vm457_vm7 = vmor %vm455_vm4, %vm456_vm5 }
  0xc9   :  { %v452_v43 = vsub.f32 1.0, %v451_v35 }
  0xcb   :  { %v1603_v41 = vpop.eup %1602  ;;  %v453_v57 = vmul.f32 %v1601_v33, %v452_v43 }
  0xcc   :  { %v436_v42 = vmul.f32 %v1603_v41, %v433_v32  ;;  %vm441_vm1 = vweird.f32 %v1603_v41 }
  0xcd   :  { %vm442_vm3 = vmor %vm440_vm2, %vm441_vm1  ;;  %v454_v11 = vadd.f32 %v1601_v33, %v453_v57 }
  0xce   :  { %v437_v47 = vsub.f32 1.0, %v436_v42 }
  0xcf   :  { %v458_v18 = vsel %vm457_vm7, %v1601_v33, %v454_v11 }
  0xd0   :  { %v421_v36 = vpop.f32.mrf.mxu1  ;;  %v438_v51 = vmul.f32 %v1603_v41, %v437_v47  ;;  %v463_v22 = vsel %vm460_vm8, %v462_v17, %v458_v18 }
  0xd1   :  { %v465_v60 = vadd.f32 %v2034_v46, %v421_v36  ;;  %v469_v23 = vsub.f32 1.0, %v463_v22  ;;  %v471_v31 = vmul.f32 0.0, %v463_v22 }
  0xd2   :  { %v439_v59 = vadd.f32 %v1603_v41, %v438_v51 }
  0xd4   :  { %v443_v4 = vsel %vm442_vm3, %v1603_v41, %v439_v59 }
  0xd5   :  { %v448_v8 = vsel %vm445_vm6, %v447_v63, %v443_v4 }
  0xd6   :  { %v466_v13 = vmul.f32 %v465_v60, %v448_v8 }
  0xd8   :  { %v423_v62 = vpop.f32.mrf.mxu1  ;;  %v467_v16 = vadd.f32 %v466_v13, %v2040_v5 }
  0xda   :  { %1604 = vtanh.f32 %v467_v16 }
  0xe0   :  { %v1605_v27 = vpop.eup %1604 }
  0xe1   :  { %v470_v30 = vmul.f32 %v1605_v27, %v469_v23 }
  0xe3   :  { %v2043_v32 = vadd.f32 %v471_v31, %v470_v30 }
  0xe5   :  { %v473_v35 = vpack.c.bf16 %v2043_v32, %v2043_v32 }
  0xe7   :  { %482 = vmatmul.bf16.vlgmr.msrb.gmra.mxu2 %v473_v35  ;;  %495 = vmatmul.bf16.vlgmr.msrb.gmra.mxu3 %v473_v35 }
  0xe8   :  { %508 = vmatmul.bf16.vlgmr.msrb.gmra.mxu0 %v473_v35  ;;  %706 = vmatpush.bf16.msrb.mxu2 %v1908_v26 }
  0xe9   :  { %783 = vmatpush.bf16.msrb.mxu3 %v1801_v15  ;;  %796 = vmatpush.bf16.msrb.mxu0 %v1809_v19 }
  0xec   :  { %707 = vmatpush.bf16.msrb.mxu2 %v1923_v40 }
  0xed   :  { %784 = vmatpush.bf16.msrb.mxu3 %v1812_v24  ;;  %797 = vmatpush.bf16.msrb.mxu0 %v1821_v28 }
  0xf0   :  { %708 = vmatpush.bf16.msrb.mxu2 %v1928_v44 }
  0xf1   :  { %785 = vmatpush.bf16.msrb.mxu3 %v1824_v34  ;;  %798 = vmatpush.bf16.msrb.mxu0 %v1833_v38 }
  0xf4   :  { %709 = vmatpush.bf16.msrb.mxu2 %v1935_v50 }
  0xf5   :  { %786 = vmatpush.bf16.msrb.mxu3 %v1842_v45  ;;  %799 = vmatpush.bf16.msrb.mxu0 %v1845_v48 }
  0xf8   :  { %710 = vmatpush.bf16.msrb.mxu2 %v1943_v54 }
  0xf9   :  { %787 = vmatpush.bf16.msrb.mxu3 %v1859_v55  ;;  %800 = vmatpush.bf16.msrb.mxu0 %v1862_v58 }
  0xfc   :  { %711 = vmatpush.bf16.msrb.mxu2 %v1949_v52 }
  0xfd   :  { %788 = vmatpush.bf16.msrb.mxu3 %v1879_v3  ;;  %801 = vmatpush.bf16.msrb.mxu0 %v1888_v9 }
 0x100   :  { %712 = vmatpush.bf16.msrb.mxu2 %v1955_v61 }
 0x101   :  { %789 = vmatpush.bf16.msrb.mxu3 %v1903_v21  ;;  %802 = vmatpush.bf16.msrb.mxu0 %v1906_v25 }
 0x104   :  { %713 = vmatpush.bf16.msrb.mxu2 %v1961_v0 }
 0x105   :  { %790 = vmatpush.bf16.msrb.mxu3 %v1917_v37  ;;  %803 = vmatpush.bf16.msrb.mxu0 %v1921_v39 }
 0x165   :  { %v509_v33 = vpop.f32.mrf.mxu0 }
 0x166   :  { %v559_v18 = vadd.f32 %v2034_v46, %v509_v33 }
 0x168   :  { %v561_v35 = vrot.slane %v559_v18, 6 }
 0x16a   :  { %v483_v36 = vpop.f32.mrf.mxu2  ;;  %v496_v41 = vpop.f32.mrf.mxu3 }
 0x16b   :  { %v515_v42 = vrot.slane %v483_v36, 6  ;;  %v516_v43 = vrot.slane %v496_v41, 6 }
 0x16d   :  { %v519_v47 = vadd.f32 %v515_v42, %v2026_v14  ;;  %v520_v49 = vadd.f32 %v516_v43, %v2023_v10  ;;  %v511_v51 = vpop.f32.mrf.mxu0 }
 0x16f   :  { %v1498_v53 = vmul.f32 -1.442695, %v519_v47  ;;  %v1499_v57 = vmul.f32 -1.442695, %v520_v49 }
 0x171   :  { %1606 = vpow2.f32 %v1498_v53 }
 0x172   :  { %1608 = vpow2.f32 %v1499_v57  ;;  %v485_v59 = vpop.f32.mrf.mxu2  ;;  %v498_v60 = vpop.f32.mrf.mxu3 }
 0x173   :  { %v569_v59 = vrot.slane %v2043_v32, 6 }
 0x177   :  { %v1607_v62 = vpop.eup %1606 }
 0x178   :  { %v1609_v63 = vpop.eup %1608  ;;  %v527_v1 = vadd.f32 1.0, %v1607_v62 }
 0x179   :  { %v528_v4 = vadd.f32 1.0, %v1609_v63 }
 0x17a   :  { %1610 = vrcp.f32 %v527_v1  ;;  %v540_v16 = vand.u32 2147483648, %v527_v1  ;;  %v538_v23 = vand.u32 2147483647, %v527_v1  ;;  %vm534_vm10 = vweird.f32 %v527_v1 }
 0x17b   :  { %1612 = vrcp.f32 %v528_v4  ;;  %v555_v43 = vand.u32 2147483648, %v528_v4  ;;  %vm549_vm14 = vweird.f32 %v528_v4  ;;  %v553_v49 = vand.u32 2147483647, %v528_v4 }
 0x17c   :  { %v541_v31 = vor.u32 1.1754944e-38, %v540_v16  ;;  %vm539_vm12 = vcmp.eq.f32.partialorder %v538_v23, 8.507059e+37 }
 0x17d   :  { %v556_v53 = vor.u32 1.1754944e-38, %v555_v43  ;;  %vm554_vm0 = vcmp.eq.f32.partialorder %v553_v49, 8.507059e+37 }
 0x180   :  { %v1611_v7 = vpop.eup %1610 }
 0x181   :  { %v1613_v8 = vpop.eup %1612  ;;  %v530_v11 = vmul.f32 %v1611_v7, %v527_v1  ;;  %vm535_vm9 = vweird.f32 %v1611_v7 }
 0x182   :  { %v545_v12 = vmul.f32 %v1613_v8, %v528_v4  ;;  %vm536_vm11 = vmor %vm534_vm10, %vm535_vm9  ;;  %vm550_vm13 = vweird.f32 %v1613_v8 }
 0x183   :  { %v531_v13 = vsub.f32 1.0, %v530_v11  ;;  %vm551_vm15 = vmor %vm549_vm14, %vm550_vm13 }
 0x184   :  { %v546_v17 = vsub.f32 1.0, %v545_v12 }
 0x185   :  { %v532_v22 = vmul.f32 %v1611_v7, %v531_v13 }
 0x186   :  { %v547_v27 = vmul.f32 %v1613_v8, %v546_v17 }
 0x187   :  { %v533_v30 = vadd.f32 %v1611_v7, %v532_v22 }
 0x188   :  { %v548_v42 = vadd.f32 %v1613_v8, %v547_v27 }
 0x189   :  { %v537_v36 = vsel %vm536_vm11, %v1611_v7, %v533_v30 }
 0x18a   :  { %v542_v41 = vsel %vm539_vm12, %v541_v31, %v537_v36  ;;  %v552_v51 = vsel %vm551_vm15, %v1613_v8, %v548_v42 }
 0x18b   :  { %v563_v47 = vmul.f32 %v561_v35, %v542_v41  ;;  %v557_v57 = vsel %vm554_vm0, %v556_v53, %v552_v51 }
 0x18c   :  { %v566_v60 = vsub.f32 1.0, %v557_v57  ;;  %v571_v1 = vmul.f32 %v569_v59, %v557_v57 }
 0x18d   :  { %v564_v33 = vadd.f32 %v563_v47, %v2040_v5 }
 0x18f   :  { %1614 = vtanh.f32 %v564_v33 }
 0x195   :  { %v1615_v62 = vpop.eup %1614 }
 0x196   :  { %v567_v63 = vmul.f32 %v1615_v62, %v566_v60 }
 0x198   :  { %v2078_v7 = vadd.f32 %v571_v1, %v567_v63 }
 0x19a   :  { %v573_v11 = vpack.c.bf16 %v2078_v7, %v2078_v7 }
 0x19c   :  { %v575_v4 = vrot.slane %v573_v11, 1 }
 0x19e   :  { %585 = vmatmul.bf16.vlgmr.msrb.gmra.mxu1 %v575_v4  ;;  %598 = vmatmul.bf16.vlgmr.msra.gmra.mxu2 %v575_v4 }
 0x19f   :  { %611 = vmatmul.bf16.vlgmr.msra.gmra.mxu3 %v575_v4  ;;  %809 = vmatpush.bf16.msrb.mxu1 %v1908_v26 }
 0x1a0   :  { %874 = vmatpush.bf16.msra.mxu2 %v1801_v15  ;;  %887 = vmatpush.bf16.msra.mxu3 %v1809_v19 }
 0x1a3   :  { %810 = vmatpush.bf16.msrb.mxu1 %v1923_v40 }
 0x1a4   :  { %875 = vmatpush.bf16.msra.mxu2 %v1812_v24  ;;  %888 = vmatpush.bf16.msra.mxu3 %v1821_v28 }
 0x1a7   :  { %811 = vmatpush.bf16.msrb.mxu1 %v1928_v44 }
 0x1a8   :  { %876 = vmatpush.bf16.msra.mxu2 %v1824_v34  ;;  %889 = vmatpush.bf16.msra.mxu3 %v1833_v38 }
 0x1ab   :  { %812 = vmatpush.bf16.msrb.mxu1 %v1935_v50 }
 0x1ac   :  { %877 = vmatpush.bf16.msra.mxu2 %v1842_v45  ;;  %890 = vmatpush.bf16.msra.mxu3 %v1845_v48 }
 0x1af   :  { %813 = vmatpush.bf16.msrb.mxu1 %v1943_v54 }
 0x1b0   :  { %878 = vmatpush.bf16.msra.mxu2 %v1859_v55  ;;  %891 = vmatpush.bf16.msra.mxu3 %v1862_v58 }
 0x1b3   :  { %814 = vmatpush.bf16.msrb.mxu1 %v1949_v52 }
 0x1b4   :  { %879 = vmatpush.bf16.msra.mxu2 %v1879_v3  ;;  %892 = vmatpush.bf16.msra.mxu3 %v1888_v9 }
 0x1b7   :  { %815 = vmatpush.bf16.msrb.mxu1 %v1955_v61 }
 0x1b8   :  { %880 = vmatpush.bf16.msra.mxu2 %v1903_v21  ;;  %893 = vmatpush.bf16.msra.mxu3 %v1906_v25 }
 0x1bb   :  { %816 = vmatpush.bf16.msrb.mxu1 %v1961_v0 }
 0x1bc   :  { %881 = vmatpush.bf16.msra.mxu2 %v1917_v37  ;;  %894 = vmatpush.bf16.msra.mxu3 %v1921_v39 }
 0x21b   :  { %v586_v32 = vpop.f32.mrf.mxu1 }
 0x21c   :  { %v618_v8 = vrot.slane %v586_v32, 4 }
 0x21e   :  { %v622_v12 = vadd.f32 %v618_v8, %v2026_v14 }
 0x220   :  { %v1500_v13 = vmul.f32 -1.442695, %v622_v12 }
 0x221   :  { %v599_v16 = vpop.f32.mrf.mxu2 }
 0x222   :  { %1616 = vpow2.f32 %v1500_v13  ;;  %v619_v17 = vrot.slane %v599_v16, 4  ;;  %v612_v18 = vpop.f32.mrf.mxu3 }
 0x223   :  { %v588_v22 = vpop.f32.mrf.mxu1  ;;  %v662_v57 = vadd.f32 %v2034_v46, %v612_v18 }
 0x224   :  { %v623_v23 = vadd.f32 %v619_v17, %v2023_v10 }
 0x225   :  { %v664_v4 = vrot.slane %v662_v57, 4 }
 0x226   :  { %v1501_v27 = vmul.f32 -1.442695, %v623_v23 }
 0x228   :  { %v1617_v30 = vpop.eup %1616  ;;  %1618 = vpow2.f32 %v1501_v27 }
 0x229   :  { %v630_v31 = vadd.f32 1.0, %v1617_v30  ;;  %v601_v35 = vpop.f32.mrf.mxu2  ;;  %v672_v30 = vrot.slane %v2078_v7, 6 }
 0x22a   :  { %v614_v36 = vpop.f32.mrf.mxu3 }
 0x22b   :  { %1620 = vrcp.f32 %v630_v31  ;;  %v643_v33 = vand.u32 2147483648, %v630_v31  ;;  %v641_v53 = vand.u32 2147483647, %v630_v31  ;;  %vm637_vm2 = vweird.f32 %v630_v31 }
 0x22d   :  { %v644_v63 = vor.u32 1.1754944e-38, %v643_v33  ;;  %vm642_vm4 = vcmp.eq.f32.partialorder %v641_v53, 8.507059e+37 }
 0x22e   :  { %v1619_v41 = vpop.eup %1618 }
 0x22f   :  { %v631_v42 = vadd.f32 1.0, %v1619_v41 }
 0x231   :  { %v1621_v43 = vpop.eup %1620  ;;  %1622 = vrcp.f32 %v631_v42  ;;  %v658_v12 = vand.u32 2147483648, %v631_v42  ;;  %v656_v16 = vand.u32 2147483647, %v631_v42  ;;  %vm652_vm6 = vweird.f32 %v631_v42 }
 0x232   :  { %v633_v47 = vmul.f32 %v1621_v43, %v630_v31  ;;  %vm638_vm1 = vweird.f32 %v1621_v43 }
 0x233   :  { %vm639_vm3 = vmor %vm637_vm2, %vm638_vm1  ;;  %v659_v23 = vor.u32 1.1754944e-38, %v658_v12  ;;  %vm657_vm8 = vcmp.eq.f32.partialorder %v656_v16, 8.507059e+37 }
 0x234   :  { %v634_v49 = vsub.f32 1.0, %v633_v47 }
 0x236   :  { %v635_v51 = vmul.f32 %v1621_v43, %v634_v49 }
 0x237   :  { %v1623_v59 = vpop.eup %1622 }
 0x238   :  { %v648_v60 = vmul.f32 %v1623_v59, %v631_v42  ;;  %v636_v62 = vadd.f32 %v1621_v43, %v635_v51  ;;  %vm653_vm5 = vweird.f32 %v1623_v59 }
 0x239   :  { %vm654_vm7 = vmor %vm652_vm6, %vm653_vm5 }
 0x23a   :  { %v649_v1 = vsub.f32 1.0, %v648_v60  ;;  %v640_v11 = vsel %vm639_vm3, %v1621_v43, %v636_v62 }
 0x23b   :  { %v645_v32 = vsel %vm642_vm4, %v644_v63, %v640_v11 }
 0x23c   :  { %v650_v8 = vmul.f32 %v1623_v59, %v649_v1  ;;  %v666_v13 = vmul.f32 %v664_v4, %v645_v32 }
 0x23e   :  { %v667_v17 = vadd.f32 %v666_v13, %v2040_v5  ;;  %v651_v18 = vadd.f32 %v1623_v59, %v650_v8 }
 0x240   :  { %1624 = vtanh.f32 %v667_v17  ;;  %v655_v22 = vsel %vm654_vm7, %v1623_v59, %v651_v18 }
 0x241   :  { %v660_v27 = vsel %vm657_vm8, %v659_v23, %v655_v22 }
 0x242   :  { %v669_v31 = vsub.f32 1.0, %v660_v27  ;;  %v674_v41 = vmul.f32 %v672_v30, %v660_v27 }
 0x246   :  { %v1625_v35 = vpop.eup %1624 }
 0x247   :  { %v670_v36 = vmul.f32 %v1625_v35, %v669_v31 }
 0x249   :  { %v2111_v43 = vadd.f32 %v674_v41, %v670_v36 }
 0x24b   :  { %v676_v42 = vpack.c.bf16 %v2111_v43, %v2111_v43 }
 0x24d   :  { %v678_v47 = vrot.slane %v676_v42, 2 }
 0x24f   :  { %688 = vmatmul.bf16.vlgmr.msra.gmra.mxu0 %v678_v47  ;;  %701 = vmatmul.bf16.vlgmr.msra.gmra.mxu1 %v678_v47 }
 0x250   :  { %714 = vmatmul.bf16.vlgmr.msrb.gmra.mxu2 %v678_v47  ;;  %900 = vmatpush.bf16.msra.mxu0 %v1908_v26 }
 0x251   :  { %977 = vmatpush.bf16.msra.mxu1 %v1801_v15  ;;  %990 = vmatpush.bf16.msrb.mxu2 %v1809_v19 }
 0x254   :  { %901 = vmatpush.bf16.msra.mxu0 %v1923_v40 }
 0x255   :  { %978 = vmatpush.bf16.msra.mxu1 %v1812_v24  ;;  %991 = vmatpush.bf16.msrb.mxu2 %v1821_v28 }
 0x258   :  { %902 = vmatpush.bf16.msra.mxu0 %v1928_v44 }
 0x259   :  { %979 = vmatpush.bf16.msra.mxu1 %v1824_v34  ;;  %992 = vmatpush.bf16.msrb.mxu2 %v1833_v38 }
 0x25c   :  { %903 = vmatpush.bf16.msra.mxu0 %v1935_v50 }
 0x25d   :  { %980 = vmatpush.bf16.msra.mxu1 %v1842_v45  ;;  %993 = vmatpush.bf16.msrb.mxu2 %v1845_v48 }
 0x260   :  { %904 = vmatpush.bf16.msra.mxu0 %v1943_v54 }
 0x261   :  { %981 = vmatpush.bf16.msra.mxu1 %v1859_v55  ;;  %994 = vmatpush.bf16.msrb.mxu2 %v1862_v58 }
 0x264   :  { %905 = vmatpush.bf16.msra.mxu0 %v1949_v52 }
 0x265   :  { %982 = vmatpush.bf16.msra.mxu1 %v1879_v3  ;;  %995 = vmatpush.bf16.msrb.mxu2 %v1888_v9 }
 0x268   :  { %906 = vmatpush.bf16.msra.mxu0 %v1955_v61 }
 0x269   :  { %983 = vmatpush.bf16.msra.mxu1 %v1903_v21  ;;  %996 = vmatpush.bf16.msrb.mxu2 %v1906_v25 }
 0x26c   :  { %907 = vmatpush.bf16.msra.mxu0 %v1961_v0 }
 0x26d   :  { %984 = vmatpush.bf16.msra.mxu1 %v1917_v37  ;;  %997 = vmatpush.bf16.msrb.mxu2 %v1921_v39 }
 0x2cc   :  { %v689_v7 = vpop.f32.mrf.mxu0  ;;  %v702_v49 = vpop.f32.mrf.mxu1 }
 0x2cd   :  { %v721_v33 = vrot.slane %v689_v7, 2  ;;  %v722_v51 = vrot.slane %v702_v49, 2 }
 0x2cf   :  { %v725_v53 = vadd.f32 %v721_v33, %v2026_v14  ;;  %v726_v57 = vadd.f32 %v722_v51, %v2023_v10 }
 0x2d1   :  { %v1502_v59 = vmul.f32 -1.442695, %v725_v53  ;;  %v1503_v60 = vmul.f32 -1.442695, %v726_v57 }
 0x2d3   :  { %1626 = vpow2.f32 %v1502_v59  ;;  %v715_v62 = vpop.f32.mrf.mxu2 }
 0x2d4   :  { %1628 = vpow2.f32 %v1503_v60  ;;  %v691_v63 = vpop.f32.mrf.mxu0  ;;  %v704_v1 = vpop.f32.mrf.mxu1  ;;  %v765_v30 = vadd.f32 %v2034_v46, %v715_v62  ;;  %v775_v62 = vrot.slane %v2111_v43, 6 }
 0x2d6   :  { %v767_v42 = vrot.slane %v765_v30, 2 }
 0x2d9   :  { %v1627_v11 = vpop.eup %1626 }
 0x2da   :  { %v1629_v4 = vpop.eup %1628  ;;  %v733_v32 = vadd.f32 1.0, %v1627_v11 }
 0x2db   :  { %v734_v8 = vadd.f32 1.0, %v1629_v4  ;;  %v717_v12 = vpop.f32.mrf.mxu2 }
 0x2dc   :  { %1630 = vrcp.f32 %v733_v32  ;;  %v746_v22 = vand.u32 2147483648, %v733_v32  ;;  %v744_v27 = vand.u32 2147483647, %v733_v32  ;;  %vm740_vm10 = vweird.f32 %v733_v32 }
 0x2dd   :  { %1632 = vrcp.f32 %v734_v8  ;;  %v761_v49 = vand.u32 2147483648, %v734_v8  ;;  %vm755_vm14 = vweird.f32 %v734_v8  ;;  %v759_v51 = vand.u32 2147483647, %v734_v8 }
 0x2de   :  { %v747_v36 = vor.u32 1.1754944e-38, %v746_v22  ;;  %vm745_vm12 = vcmp.eq.f32.partialorder %v744_v27, 8.507059e+37 }
 0x2df   :  { %v762_v59 = vor.u32 1.1754944e-38, %v761_v49  ;;  %vm760_vm0 = vcmp.eq.f32.partialorder %v759_v51, 8.507059e+37 }
 0x2e2   :  { %v1631_v13 = vpop.eup %1630 }
 0x2e3   :  { %v1633_v16 = vpop.eup %1632  ;;  %v736_v17 = vmul.f32 %v1631_v13, %v733_v32  ;;  %vm741_vm9 = vweird.f32 %v1631_v13 }
 0x2e4   :  { %v751_v14 = vmul.f32 %v1633_v16, %v734_v8  ;;  %vm742_vm11 = vmor %vm740_vm10, %vm741_vm9  ;;  %vm756_vm13 = vweird.f32 %v1633_v16 }
 0x2e5   :  { %v737_v18 = vsub.f32 1.0, %v736_v17  ;;  %vm757_vm15 = vmor %vm755_vm14, %vm756_vm13 }
 0x2e6   :  { %v752_v10 = vsub.f32 1.0, %v751_v14 }
 0x2e7   :  { %v738_v23 = vmul.f32 %v1631_v13, %v737_v18 }
 0x2e8   :  { %v753_v31 = vmul.f32 %v1633_v16, %v752_v10 }
 0x2e9   :  { %v739_v35 = vadd.f32 %v1631_v13, %v738_v23 }
 0x2ea   :  { %v754_v7 = vadd.f32 %v1633_v16, %v753_v31 }
 0x2eb   :  { %v743_v41 = vsel %vm742_vm11, %v1631_v13, %v739_v35 }
 0x2ec   :  { %v748_v47 = vsel %vm745_vm12, %v747_v36, %v743_v41  ;;  %v758_v57 = vsel %vm757_vm15, %v1633_v16, %v754_v7  ;;  %v2178_v36 = vadd.f32 %v2071_v29, %v103_v56 }
 0x2ed   :  { %v769_v33 = vmul.f32 %v767_v42, %v748_v47  ;;  %v763_v60 = vsel %vm760_vm0, %v762_v59, %v758_v57 }
 0x2ee   :  { %v772_v63 = vsub.f32 1.0, %v763_v60  ;;  %v777_v4 = vmul.f32 %v775_v62, %v763_v60 }
 0x2ef   :  { %v770_v53 = vadd.f32 %v769_v33, %v2040_v5 }
 0x2f1   :  { %1634 = vtanh.f32 %v770_v53 }
 0x2f7   :  { %v1635_v1 = vpop.eup %1634 }
 0x2f8   :  { %v773_v11 = vmul.f32 %v1635_v1, %v772_v63 }
 0x2fa   :  { %v2144_v32 = vadd.f32 %v777_v4, %v773_v11 }
 0x2fc   :  { %v779_v12 = vpack.c.bf16 %v2144_v32, %v2144_v32  ;;  %v869_v53 = vrot.slane %v2144_v32, 6 }
 0x2fe   :  { %v781_v8 = vrot.slane %v779_v12, 3 }
 0x300   :  { %791 = vmatmul.bf16.vlgmr.msrb.gmra.mxu3 %v781_v8  ;;  %804 = vmatmul.bf16.vlgmr.msrb.gmra.mxu0 %v781_v8 }
 0x301   :  { %817 = vmatmul.bf16.vlgmr.msrb.gmra.mxu1 %v781_v8  ;;  %1003 = vmatpush.bf16.msrb.mxu3 %v1908_v26 }
 0x302   :  { %1080 = vmatpush.bf16.msrb.mxu0 %v1801_v15  ;;  %1093 = vmatpush.bf16.msrb.mxu1 %v1809_v19 }
 0x305   :  { %1004 = vmatpush.bf16.msrb.mxu3 %v1923_v40 }
 0x306   :  { %1081 = vmatpush.bf16.msrb.mxu0 %v1812_v24  ;;  %1094 = vmatpush.bf16.msrb.mxu1 %v1821_v28 }
 0x309   :  { %1005 = vmatpush.bf16.msrb.mxu3 %v1928_v44 }
 0x30a   :  { %1082 = vmatpush.bf16.msrb.mxu0 %v1824_v34  ;;  %1095 = vmatpush.bf16.msrb.mxu1 %v1833_v38 }
 0x30d   :  { %1006 = vmatpush.bf16.msrb.mxu3 %v1935_v50 }
 0x30e   :  { %1083 = vmatpush.bf16.msrb.mxu0 %v1842_v45  ;;  %1096 = vmatpush.bf16.msrb.mxu1 %v1845_v48 }
 0x311   :  { %1007 = vmatpush.bf16.msrb.mxu3 %v1943_v54 }
 0x312   :  { %1084 = vmatpush.bf16.msrb.mxu0 %v1859_v55  ;;  %1097 = vmatpush.bf16.msrb.mxu1 %v1862_v58 }
 0x315   :  { %1008 = vmatpush.bf16.msrb.mxu3 %v1949_v52 }
 0x316   :  { %1085 = vmatpush.bf16.msrb.mxu0 %v1879_v3  ;;  %1098 = vmatpush.bf16.msrb.mxu1 %v1888_v9 }
 0x319   :  { %1009 = vmatpush.bf16.msrb.mxu3 %v1955_v61 }
 0x31a   :  { %1086 = vmatpush.bf16.msrb.mxu0 %v1903_v21  ;;  %1099 = vmatpush.bf16.msrb.mxu1 %v1906_v25 }
 0x31d   :  { %1010 = vmatpush.bf16.msrb.mxu3 %v1961_v0 }
 0x31e   :  { %1087 = vmatpush.bf16.msrb.mxu0 %v1917_v37  ;;  %1100 = vmatpush.bf16.msrb.mxu1 %v1921_v39 }
 0x37d   :  { %v805_v15 = vpop.f32.mrf.mxu0 }
 0x37e   :  { %v823_v19 = vadd.f32 %v805_v15, %v2029_v20  ;;  %v818_v24 = vpop.f32.mrf.mxu1 }
 0x37f   :  { %v862_v27 = vadd.f32 %v2034_v46, %v818_v24 }
 0x380   :  { %v1505_v28 = vmul.f32 -1.442695, %v823_v19 }
 0x382   :  { %1636 = vpow2.f32 %v1505_v28 }
 0x383   :  { %v792_v34 = vpop.f32.mrf.mxu3 }
 0x384   :  { %v822_v38 = vadd.f32 %v792_v34, %v2020_v6 }
 0x385   :  { %v807_v45 = vpop.f32.mrf.mxu0 }
 0x386   :  { %v1504_v48 = vmul.f32 -1.442695, %v822_v38  ;;  %v820_v55 = vpop.f32.mrf.mxu1 }
 0x388   :  { %v1637_v58 = vpop.eup %1636  ;;  %1638 = vpow2.f32 %v1504_v48 }
 0x389   :  { %v831_v3 = vadd.f32 1.0, %v1637_v58 }
 0x38b   :  { %v794_v9 = vpop.f32.mrf.mxu3  ;;  %1640 = vrcp.f32 %v831_v3  ;;  %v858_v41 = vand.u32 2147483648, %v831_v3  ;;  %vm852_vm6 = vweird.f32 %v831_v3  ;;  %v856_v47 = vand.u32 2147483647, %v831_v3 }
 0x38d   :  { %v859_v33 = vor.u32 1.1754944e-38, %v858_v41  ;;  %vm857_vm8 = vcmp.eq.f32.partialorder %v856_v47, 8.507059e+37 }
 0x38e   :  { %v1639_v21 = vpop.eup %1638 }
 0x38f   :  { %v830_v25 = vadd.f32 1.0, %v1639_v21 }
 0x391   :  { %1642 = vrcp.f32 %v830_v25  ;;  %v1641_v37 = vpop.eup %1640  ;;  %v843_v17 = vand.u32 2147483648, %v830_v25  ;;  %v841_v18 = vand.u32 2147483647, %v830_v25  ;;  %vm837_vm2 = vweird.f32 %v830_v25 }
 0x392   :  { %v848_v39 = vmul.f32 %v1641_v37, %v831_v3  ;;  %vm853_vm5 = vweird.f32 %v1641_v37 }
 0x393   :  { %v844_v23 = vor.u32 1.1754944e-38, %v843_v17  ;;  %vm842_vm4 = vcmp.eq.f32.partialorder %v841_v18, 8.507059e+37  ;;  %vm854_vm7 = vmor %vm852_vm6, %vm853_vm5 }
 0x394   :  { %v849_v13 = vsub.f32 1.0, %v848_v39 }
 0x396   :  { %v850_v10 = vmul.f32 %v1641_v37, %v849_v13 }
 0x397   :  { %v1643_v5 = vpop.eup %1642 }
 0x398   :  { %v833_v43 = vmul.f32 %v1643_v5, %v830_v25  ;;  %vm838_vm1 = vweird.f32 %v1643_v5  ;;  %v851_v35 = vadd.f32 %v1641_v37, %v850_v10 }
 0x399   :  { %vm839_vm3 = vmor %vm837_vm2, %vm838_vm1 }
 0x39a   :  { %v834_v16 = vsub.f32 1.0, %v833_v43  ;;  %v855_v49 = vsel %vm854_vm7, %v1641_v37, %v851_v35 }
 0x39b   :  { %v860_v51 = vsel %vm857_vm8, %v859_v33, %v855_v49 }
 0x39c   :  { %v835_v14 = vmul.f32 %v1643_v5, %v834_v16  ;;  %v866_v57 = vsub.f32 1.0, %v860_v51  ;;  %v871_v60 = vmul.f32 %v869_v53, %v860_v51 }
 0x39e   :  { %v836_v22 = vadd.f32 %v1643_v5, %v835_v14 }
 0x3a0   :  { %v840_v30 = vsel %vm839_vm3, %v1643_v5, %v836_v22 }
 0x3a1   :  { %v845_v31 = vsel %vm842_vm4, %v844_v23, %v840_v30 }
 0x3a2   :  { %v863_v42 = vmul.f32 %v862_v27, %v845_v31 }
 0x3a4   :  { %v864_v7 = vadd.f32 %v863_v42, %v2178_v36 }
 0x3a6   :  { %1644 = vtanh.f32 %v864_v7 }
 0x3ac   :  { %v1645_v59 = vpop.eup %1644 }
 0x3ad   :  { %v867_v2 = vmul.f32 %v1645_v59, %v866_v57 }
 0x3af   :  { %v2182_v56 = vadd.f32 %v871_v60, %v867_v2 }
 0x3b1   :  { %v873_v29 = vpack.c.bf16 %v2182_v56, %v2182_v56  ;;  %v969_v22 = vrot.slane %v2182_v56, 6 }
 0x3b3   :  { %882 = vmatmul.bf16.vlgmr.msra.gmra.mxu2 %v873_v29  ;;  %895 = vmatmul.bf16.vlgmr.msra.gmra.mxu3 %v873_v29 }
 0x3b4   :  { %908 = vmatmul.bf16.vlgmr.msra.gmra.mxu0 %v873_v29  ;;  %1106 = vmatpush.bf16.msra.mxu2 %v1908_v26 }
 0x3b8   :  { %1107 = vmatpush.bf16.msra.mxu2 %v1923_v40 }
 0x3bc   :  { %1108 = vmatpush.bf16.msra.mxu2 %v1928_v44 }
 0x3c0   :  { %1109 = vmatpush.bf16.msra.mxu2 %v1935_v50 }
 0x3c4   :  { %1110 = vmatpush.bf16.msra.mxu2 %v1943_v54 }
 0x3c8   :  { %1111 = vmatpush.bf16.msra.mxu2 %v1949_v52 }
 0x3cc   :  { %1112 = vmatpush.bf16.msra.mxu2 %v1955_v61 }
 0x3d0   :  { %1113 = vmatpush.bf16.msra.mxu2 %v1961_v0 }
 0x431   :  { %v909_v62 = vpop.f32.mrf.mxu0 }
 0x432   :  { %v959_v48 = vadd.f32 %v2034_v46, %v909_v62 }
 0x434   :  { %v961_v25 = vrot.slane %v959_v48, 6 }
 0x436   :  { %v883_v63 = vpop.f32.mrf.mxu2  ;;  %v896_v1 = vpop.f32.mrf.mxu3 }
 0x437   :  { %v915_v11 = vrot.slane %v883_v63, 6  ;;  %v916_v4 = vrot.slane %v896_v1, 6 }
 0x439   :  { %v919_v26 = vadd.f32 %v915_v11, %v2020_v6  ;;  %v920_v40 = vadd.f32 %v916_v4, %v2029_v20  ;;  %v911_v44 = vpop.f32.mrf.mxu0 }
 0x43b   :  { %v1506_v32 = vmul.f32 -1.442695, %v919_v26  ;;  %v1507_v50 = vmul.f32 -1.442695, %v920_v40 }
 0x43d   :  { %1646 = vpow2.f32 %v1506_v32 }
 0x43e   :  { %1648 = vpow2.f32 %v1507_v50  ;;  %v885_v54 = vpop.f32.mrf.mxu2  ;;  %v898_v52 = vpop.f32.mrf.mxu3 }
 0x443   :  { %v1647_v12 = vpop.eup %1646 }
 0x444   :  { %v1649_v61 = vpop.eup %1648  ;;  %v927_v8 = vadd.f32 1.0, %v1647_v12 }
 0x445   :  { %v928_v0 = vadd.f32 1.0, %v1649_v61 }
 0x446   :  { %1650 = vrcp.f32 %v927_v8  ;;  %v940_v38 = vand.u32 2147483648, %v927_v8  ;;  %v938_v58 = vand.u32 2147483647, %v927_v8  ;;  %vm934_vm10 = vweird.f32 %v927_v8 }
 0x447   :  { %1652 = vrcp.f32 %v928_v0  ;;  %v955_v43 = vand.u32 2147483648, %v928_v0  ;;  %vm949_vm14 = vweird.f32 %v928_v0  ;;  %v953_v16 = vand.u32 2147483647, %v928_v0 }
 0x448   :  { %v941_v21 = vor.u32 1.1754944e-38, %v940_v38  ;;  %vm939_vm12 = vcmp.eq.f32.partialorder %v938_v58, 8.507059e+37 }
 0x449   :  { %v956_v18 = vor.u32 1.1754944e-38, %v955_v43  ;;  %vm954_vm0 = vcmp.eq.f32.partialorder %v953_v16, 8.507059e+37 }
 0x44c   :  { %v1651_v15 = vpop.eup %1650 }
 0x44d   :  { %v1653_v19 = vpop.eup %1652  ;;  %v930_v24 = vmul.f32 %v1651_v15, %v927_v8  ;;  %vm935_vm9 = vweird.f32 %v1651_v15 }
 0x44e   :  { %v945_v28 = vmul.f32 %v1653_v19, %v928_v0  ;;  %vm936_vm11 = vmor %vm934_vm10, %vm935_vm9  ;;  %vm950_vm13 = vweird.f32 %v1653_v19 }
 0x44f   :  { %v931_v34 = vsub.f32 1.0, %v930_v24  ;;  %vm951_vm15 = vmor %vm949_vm14, %vm950_vm13 }
 0x450   :  { %v946_v45 = vsub.f32 1.0, %v945_v28 }
 0x451   :  { %v932_v55 = vmul.f32 %v1651_v15, %v931_v34 }
 0x452   :  { %v947_v3 = vmul.f32 %v1653_v19, %v946_v45 }
 0x453   :  { %v933_v9 = vadd.f32 %v1651_v15, %v932_v55 }
 0x454   :  { %v948_v5 = vadd.f32 %v1653_v19, %v947_v3 }
 0x455   :  { %v937_v37 = vsel %vm936_vm11, %v1651_v15, %v933_v9 }
 0x456   :  { %v942_v39 = vsel %vm939_vm12, %v941_v21, %v937_v37  ;;  %v952_v14 = vsel %vm951_vm15, %v1653_v19, %v948_v5 }
 0x457   :  { %v963_v13 = vmul.f32 %v961_v25, %v942_v39  ;;  %v957_v10 = vsel %vm954_vm0, %v956_v18, %v952_v14 }
 0x458   :  { %v966_v23 = vsub.f32 1.0, %v957_v10  ;;  %v971_v31 = vmul.f32 %v969_v22, %v957_v10 }
 0x459   :  { %v964_v17 = vadd.f32 %v963_v13, %v2178_v36 }
 0x45b   :  { %1654 = vtanh.f32 %v964_v17 }
 0x461   :  { %v1655_v27 = vpop.eup %1654 }
 0x462   :  { %v967_v30 = vmul.f32 %v1655_v27, %v966_v23 }
 0x464   :  { %v2199_v35 = vadd.f32 %v971_v31, %v967_v30 }
 0x466   :  { %v973_v41 = vpack.c.bf16 %v2199_v35, %v2199_v35  ;;  %v1072_v9 = vrot.slane %v2199_v35, 6 }
 0x468   :  { %v975_v42 = vrot.slane %v973_v41, 1 }
 0x46a   :  { %985 = vmatmul.bf16.vlgmr.msra.gmra.mxu1 %v975_v42  ;;  %998 = vmatmul.bf16.vlgmr.msrb.gmra.mxu2 %v975_v42 }
 0x46b   :  { %1011 = vmatmul.bf16.vlgmr.msrb.gmra.mxu3 %v975_v42 }
 0x4e7   :  { %v986_v47 = vpop.f32.mrf.mxu1 }
 0x4e8   :  { %v1018_v7 = vrot.slane %v986_v47, 4 }
 0x4ea   :  { %v1022_v49 = vadd.f32 %v1018_v7, %v2020_v6 }
 0x4ec   :  { %v1508_v33 = vmul.f32 -1.442695, %v1022_v49 }
 0x4ed   :  { %v999_v51 = vpop.f32.mrf.mxu2 }
 0x4ee   :  { %1656 = vpow2.f32 %v1508_v33  ;;  %v1019_v53 = vrot.slane %v999_v51, 4  ;;  %v1012_v57 = vpop.f32.mrf.mxu3 }
 0x4ef   :  { %v988_v59 = vpop.f32.mrf.mxu1  ;;  %v1062_v54 = vadd.f32 %v2034_v46, %v1012_v57 }
 0x4f0   :  { %v1023_v2 = vadd.f32 %v1019_v53, %v2029_v20 }
 0x4f1   :  { %v1064_v19 = vrot.slane %v1062_v54, 4 }
 0x4f2   :  { %v1509_v60 = vmul.f32 -1.442695, %v1023_v2 }
 0x4f4   :  { %v1657_v56 = vpop.eup %1656  ;;  %1658 = vpow2.f32 %v1509_v60 }
 0x4f5   :  { %v1030_v29 = vadd.f32 1.0, %v1657_v56  ;;  %v1001_v62 = vpop.f32.mrf.mxu2  ;;  %v1676_v56 = vld [vmem:[%s2277_s4] ss:$0 sm:$0xff] }
 0x4f6   :  { %v1014_v63 = vpop.f32.mrf.mxu3 }
 0x4f7   :  { %1660 = vrcp.f32 %v1030_v29  ;;  %v1043_v44 = vand.u32 2147483648, %v1030_v29  ;;  %v1041_v50 = vand.u32 2147483647, %v1030_v29  ;;  %vm1037_vm2 = vweird.f32 %v1030_v29 }
 0x4f9   :  { %v1044_v8 = vor.u32 1.1754944e-38, %v1043_v44  ;;  %vm1042_vm4 = vcmp.eq.f32.partialorder %v1041_v50, 8.507059e+37 }
 0x4fa   :  { %v1659_v1 = vpop.eup %1658 }
 0x4fb   :  { %v1031_v11 = vadd.f32 1.0, %v1659_v1 }
 0x4fd   :  { %v1661_v4 = vpop.eup %1660  ;;  %1662 = vrcp.f32 %v1031_v11  ;;  %v1058_v34 = vand.u32 2147483648, %v1031_v11  ;;  %v1056_v45 = vand.u32 2147483647, %v1031_v11  ;;  %vm1052_vm6 = vweird.f32 %v1031_v11 }
 0x4fe   :  { %v1033_v26 = vmul.f32 %v1661_v4, %v1030_v29  ;;  %vm1038_vm1 = vweird.f32 %v1661_v4 }
 0x4ff   :  { %vm1039_vm3 = vmor %vm1037_vm2, %vm1038_vm1  ;;  %v1059_v58 = vor.u32 1.1754944e-38, %v1058_v34  ;;  %vm1057_vm8 = vcmp.eq.f32.partialorder %v1056_v45, 8.507059e+37 }
 0x500   :  { %v1034_v40 = vsub.f32 1.0, %v1033_v26 }
 0x502   :  { %v1035_v32 = vmul.f32 %v1661_v4, %v1034_v40 }
 0x503   :  { %v1663_v52 = vpop.eup %1662 }
 0x504   :  { %v1048_v12 = vmul.f32 %v1663_v52, %v1031_v11  ;;  %v1036_v61 = vadd.f32 %v1661_v4, %v1035_v32  ;;  %vm1053_vm5 = vweird.f32 %v1663_v52 }
 0x505   :  { %vm1054_vm7 = vmor %vm1052_vm6, %vm1053_vm5 }
 0x506   :  { %v1049_v0 = vsub.f32 1.0, %v1048_v12  ;;  %v1040_v15 = vsel %vm1039_vm3, %v1661_v4, %v1036_v61 }
 0x507   :  { %v1045_v24 = vsel %vm1042_vm4, %v1044_v8, %v1040_v15 }
 0x508   :  { %v1050_v28 = vmul.f32 %v1663_v52, %v1049_v0  ;;  %v1066_v38 = vmul.f32 %v1064_v19, %v1045_v24 }
 0x50a   :  { %v1067_v48 = vadd.f32 %v1066_v38, %v2178_v36  ;;  %v1051_v46 = vadd.f32 %v1663_v52, %v1050_v28 }
 0x50c   :  { %1664 = vtanh.f32 %v1067_v48  ;;  %v1055_v55 = vsel %vm1054_vm7, %v1663_v52, %v1051_v46 }
 0x50d   :  { %v1060_v3 = vsel %vm1057_vm8, %v1059_v58, %v1055_v55 }
 0x50e   :  { %v1069_v21 = vsub.f32 1.0, %v1060_v3  ;;  %v1074_v39 = vmul.f32 %v1072_v9, %v1060_v3 }
 0x512   :  { %v1665_v25 = vpop.eup %1664 }
 0x513   :  { %v1070_v37 = vmul.f32 %v1665_v25, %v1069_v21 }
 0x515   :  { %v2208_v5 = vadd.f32 %v1074_v39, %v1070_v37 }
 0x517   :  { %v1076_v43 = vpack.c.bf16 %v2208_v5, %v2208_v5  ;;  %v1175_v8 = vrot.slane %v2208_v5, 6 }
 0x519   :  { %v1078_v13 = vrot.slane %v1076_v43, 2 }
 0x51b   :  { %1088 = vmatmul.bf16.vlgmr.msrb.gmra.mxu0 %v1078_v13  ;;  %1101 = vmatmul.bf16.vlgmr.msrb.gmra.mxu1 %v1078_v13 }
 0x51c   :  { %1114 = vmatmul.bf16.vlgmr.msra.gmra.mxu2 %v1078_v13 }
 0x598   :  { %v1089_v16 = vpop.f32.mrf.mxu0  ;;  %v1102_v17 = vpop.f32.mrf.mxu1 }
 0x599   :  { %v1121_v14 = vrot.slane %v1089_v16, 2  ;;  %v1122_v18 = vrot.slane %v1102_v17, 2 }
 0x59b   :  { %v1125_v10 = vadd.f32 %v1121_v14, %v2020_v6  ;;  %v1126_v22 = vadd.f32 %v1122_v18, %v2029_v20 }
 0x59d   :  { %v1510_v23 = vmul.f32 -1.442695, %v1125_v10  ;;  %v1511_v27 = vmul.f32 -1.442695, %v1126_v22 }
 0x59f   :  { %1666 = vpow2.f32 %v1510_v23  ;;  %v1115_v30 = vpop.f32.mrf.mxu2 }
 0x5a0   :  { %1668 = vpow2.f32 %v1511_v27  ;;  %v1091_v31 = vpop.f32.mrf.mxu0  ;;  %v1104_v35 = vpop.f32.mrf.mxu1  ;;  %v1165_v29 = vadd.f32 %v1676_v56, %v1115_v30 }
 0x5a2   :  { %v1167_v4 = vrot.slane %v1165_v29, 2 }
 0x5a5   :  { %v1667_v41 = vpop.eup %1666 }
 0x5a6   :  { %v1669_v42 = vpop.eup %1668  ;;  %v1133_v47 = vadd.f32 1.0, %v1667_v41 }
 0x5a7   :  { %v1134_v7 = vadd.f32 1.0, %v1669_v42  ;;  %v1117_v49 = vpop.f32.mrf.mxu2 }
 0x5a8   :  { %1670 = vrcp.f32 %v1133_v47  ;;  %v1146_v59 = vand.u32 2147483648, %v1133_v47  ;;  %v1144_v60 = vand.u32 2147483647, %v1133_v47  ;;  %vm1140_vm10 = vweird.f32 %v1133_v47 }
 0x5a9   :  { %1672 = vrcp.f32 %v1134_v7  ;;  %v1161_v44 = vand.u32 2147483648, %v1134_v7  ;;  %vm1155_vm14 = vweird.f32 %v1134_v7  ;;  %v1159_v50 = vand.u32 2147483647, %v1134_v7 }
 0x5aa   :  { %v1147_v1 = vor.u32 1.1754944e-38, %v1146_v59  ;;  %vm1145_vm12 = vcmp.eq.f32.partialorder %v1144_v60, 8.507059e+37 }
 0x5ab   :  { %v1162_v12 = vor.u32 1.1754944e-38, %v1161_v44  ;;  %vm1160_vm0 = vcmp.eq.f32.partialorder %v1159_v50, 8.507059e+37 }
 0x5ae   :  { %v1671_v33 = vpop.eup %1670 }
 0x5af   :  { %v1673_v51 = vpop.eup %1672  ;;  %v1136_v53 = vmul.f32 %v1671_v33, %v1133_v47  ;;  %vm1141_vm9 = vweird.f32 %v1671_v33 }
 0x5b0   :  { %v1151_v6 = vmul.f32 %v1673_v51, %v1134_v7  ;;  %vm1142_vm11 = vmor %vm1140_vm10, %vm1141_vm9  ;;  %vm1156_vm13 = vweird.f32 %v1673_v51 }
 0x5b1   :  { %v1137_v57 = vsub.f32 1.0, %v1136_v53  ;;  %vm1157_vm15 = vmor %vm1155_vm14, %vm1156_vm13 }
 0x5b2   :  { %v1152_v20 = vsub.f32 1.0, %v1151_v6 }
 0x5b3   :  { %v1138_v2 = vmul.f32 %v1671_v33, %v1137_v57 }
 0x5b4   :  { %v1153_v62 = vmul.f32 %v1673_v51, %v1152_v20 }
 0x5b5   :  { %v1139_v63 = vadd.f32 %v1671_v33, %v1138_v2 }
 0x5b6   :  { %v1154_v40 = vadd.f32 %v1673_v51, %v1153_v62 }
 0x5b7   :  { %v1143_v11 = vsel %vm1142_vm11, %v1671_v33, %v1139_v63 }
 0x5b8   :  { %v1148_v26 = vsel %vm1145_vm12, %v1147_v1, %v1143_v11  ;;  %v1158_v52 = vsel %vm1157_vm15, %v1673_v51, %v1154_v40 }
 0x5b9   :  { %v1169_v32 = vmul.f32 %v1167_v4, %v1148_v26  ;;  %v1163_v61 = vsel %vm1160_vm0, %v1162_v12, %v1158_v52 }
 0x5ba   :  { %v1172_v0 = vsub.f32 1.0, %v1163_v61  ;;  %v1177_v24 = vmul.f32 %v1175_v8, %v1163_v61 }
 0x5bb   :  { %v1170_v54 = vadd.f32 %v1169_v32, %v2178_v36 }
 0x5bd   :  { %1674 = vtanh.f32 %v1170_v54 }
 0x5c3   :  { %v1675_v15 = vpop.eup %1674 }
 0x5c4   :  { %v1173_v19 = vmul.f32 %v1675_v15, %v1172_v0 }
 0x5c6   :  { %v1178_v28 = vadd.f32 %v1177_v24, %v1173_v19 }
 0x5c7   :  { %1709 = dma.done.wait [#allocation3], 1024 }
 0x5c8   :  { %1710 = vsyncadd [#allocation3], 4294966272  ;;  %v1590_v34 = vld [vmem:[#allocation2 + $0x38] sm:$0xff]  ;;  %v1589_v38 = vld [vmem:[#allocation2 + $0x28] sm:$0xff]  ;;  %v1183_v18 = vpack.c.bf16 %v1178_v28, %v1178_v28  ;;  %vm1328_vm4 = vcmask 1024  }
 0x5c9   :  { %1255 = vmatpush.bf16.msra.mxu3 %v1590_v34  ;;  %v1284_v36 = vld [vmem:[%s2279_s6 + $0x78] sm:$0xff]  ;;  %v1283_v45 = vld [vmem:[%s2279_s6 + $0x70] sm:$0xff]  ;;  %v1282_v48 = vld [vmem:[%s2279_s6 + $0x68] sm:$0xff] }
 0x5ca   :  { %1289 = vmatpush.msra.mxu0 %v1284_v36  ;;  %v1588_v46 = vld [vmem:[#allocation2 + $0x20] sm:$0xff]  ;;  %v1280_v58 = vld [vmem:[%s2279_s6 + $0x58] sm:$0xff]  ;;  %v1587_v3 = vld [vmem:[#allocation2 + $0x8] sm:$0xff]  ;;  %v1205_v22 = vrot.slane %v1183_v18, 3 }
 0x5cb   :  { %v1281_v55 = vld [vmem:[%s2279_s6 + $0x60] sm:$0xff]  ;;  %v1279_v9 = vld [vmem:[%s2279_s6 + $0x50] sm:$0xff]  ;;  %v1278_v21 = vld [vmem:[%s2279_s6 + $0x48] sm:$0xff] }
 0x5cc   :  { %1290 = vmatpush.msra.mxu0 %v1283_v45  ;;  %v1586_v25 = vld [vmem:[#allocation2 + $0x10] sm:$0xff]  ;;  %v1277_v37 = vld [vmem:[%s2279_s6 + $0x40] sm:$0xff]  ;;  %v1276_v39 = vld [vmem:[%s2279_s6 + $0x38] sm:$0xff] }
 0x5cd   :  { %1256 = vmatpush.bf16.msra.mxu3 %v1589_v38  ;;  %v1585_v5 = vld [vmem:[#allocation2 + $0x18] sm:$0xff]  ;;  %v1275_v43 = vld [vmem:[%s2279_s6 + $0x30] sm:$0xff]  ;;  %v1274_v13 = vld [vmem:[%s2279_s6 + $0x28] sm:$0xff] }
 0x5ce   :  { %1291 = vmatpush.msra.mxu0 %v1282_v48  ;;  %v1584_v16 = vld [vmem:[#allocation2] sm:$0xff]  ;;  %v1272_v14 = vld [vmem:[%s2279_s6 + $0x18] sm:$0xff]  ;;  %v1583_v10 = vld [vmem:[#allocation2 + $0x30] sm:$0xff] }
 0x5cf   :  { %v1273_v17 = vld [vmem:[%s2279_s6 + $0x20] sm:$0xff]  ;;  %v1271_v23 = vld [vmem:[%s2279_s6 + $0x10] sm:$0xff]  ;;  %v1270_v27 = vld [vmem:[%s2279_s6 + $0x8] sm:$0xff] }
 0x5d0   :  { %1292 = vmatpush.msra.mxu0 %v1281_v55  ;;  %v1269_v30 = vld [vmem:[%s2279_s6] sm:$0xff] }
 0x5d1   :  { %1257 = vmatpush.bf16.msra.mxu3 %v1588_v46  ;;  %v1677_v31 = vld [vmem:[%s2278_s5] ss:$0 sm:$0xff] }
 0x5d2   :  { %1293 = vmatpush.msra.mxu0 %v1280_v58  ;;  %v1678_v7 = vld [vmem:[#allocation4] ss:$0 sm:$0xff] }
 0x5d4   :  { %1294 = vmatpush.msra.mxu0 %v1279_v9 }
 0x5d5   :  { %1258 = vmatpush.bf16.msra.mxu3 %v1587_v3 }
 0x5d6   :  { %1295 = vmatpush.msra.mxu0 %v1278_v21 }
 0x5d8   :  { %1296 = vmatpush.msra.mxu0 %v1277_v37 }
 0x5d9   :  { %1259 = vmatpush.bf16.msra.mxu3 %v1586_v25 }
 0x5da   :  { %1297 = vmatpush.msra.mxu0 %v1276_v39 }
 0x5dc   :  { %1298 = vmatpush.msra.mxu0 %v1275_v43 }
 0x5dd   :  { %1260 = vmatpush.bf16.msra.mxu3 %v1585_v5 }
 0x5de   :  { %1299 = vmatpush.msra.mxu0 %v1274_v13 }
 0x5e0   :  { %1300 = vmatpush.msra.mxu0 %v1273_v17 }
 0x5e1   :  { %1261 = vmatpush.bf16.msra.mxu3 %v1584_v16 }
 0x5e2   :  { %1301 = vmatpush.msra.mxu0 %v1272_v14 }
 0x5e4   :  { %1302 = vmatpush.msra.mxu0 %v1271_v23 }
 0x5e5   :  { %1262 = vmatpush.bf16.msra.mxu3 %v1583_v10 }
 0x5e6   :  { %1303 = vmatpush.msra.mxu0 %v1270_v27 }
 0x5e8   :  { %1263 = vmatmul.bf16.vlgmr.msra.gmra.mxu3 %v1205_v22  ;;  %1304 = vmatpush.msra.mxu0 %v1269_v30 }
 0x66b   :  { %v1264_v35 = vpop.f32.mrf.mxu3 }
 0x66c   :  { %v1265_v41 = vadd.f32 %v1677_v31, %v1264_v35 }
 0x66e   :  { %v1268_v42 = vmax.f32 %v1265_v41, 0.0 }
 0x670   :  { %1305 = vmatmul.f32.vlgmr.msra.gmra.mxu0 %v1268_v42 }
 0x673   :  { %v1266_v47 = vpop.f32.mrf.mxu3 }
 0x6ed   :  { %v1306_v49 = vpop.f32.mrf.mxu0 }
 0x6ee   :  { %v1307_v33 = vadd.f32 %v1678_v7, %v1306_v49 }
 0x6f0   :  { %v1544_v51 = vmul.f32 -1.442695, %v1307_v33 }
 0x6f2   :  { %1679 = vpow2.f32 %v1544_v51 }
 0x6f8   :  { %v1680_v53 = vpop.eup %1679 }
 0x6f9   :  { %v1312_v6 = vadd.f32 1.0, %v1680_v53 }
 0x6fb   :  { %1681 = vrcp.f32 %v1312_v6  ;;  %v1324_v2 = vand.u32 2147483648, %v1312_v6  ;;  %v1322_v56 = vand.u32 2147483647, %v1312_v6  ;;  %vm1318_vm2 = vweird.f32 %v1312_v6 }
 0x6fd   :  { %v1325_v62 = vor.u32 1.1754944e-38, %v1324_v2  ;;  %vm1323_vm5 = vcmp.eq.f32.partialorder %v1322_v56, 8.507059e+37 }
 0x701   :  { %v1682_v57 = vpop.eup %1681 }
 0x702   :  { %v1314_v20 = vmul.f32 %v1682_v57, %v1312_v6  ;;  %vm1319_vm1 = vweird.f32 %v1682_v57 }
 0x703   :  { %vm1320_vm3 = vmor %vm1318_vm2, %vm1319_vm1 }
 0x704   :  { %v1315_v59 = vsub.f32 1.0, %v1314_v20 }
 0x706   :  { %v1316_v60 = vmul.f32 %v1682_v57, %v1315_v59 }
 0x708   :  { %v1317_v29 = vadd.f32 %v1682_v57, %v1316_v60 }
 0x70a   :  { %v1321_v63 = vsel %vm1320_vm3, %v1682_v57, %v1317_v29 }
 0x70b   :  { %v1326_v1 = vsel %vm1323_vm5, %v1325_v62, %v1321_v63 }
 0x70c   :  { %1329 = vst.msk [vmem:[%s2282_s9] sm:$0x3] %vm1328_vm4, %v1326_v1 }
 0x70d   :  { %1334 = vsyncpa [#allocation6], 1 }
 0x70e   :  { %1335 = vsyncmov [#allocation3] }
 0x711   :  { %s1336_s19 = vpop.sfrf %1335 }
 0x712   :  { %p1545_p0 = scmp.ne.s32.totalorder %s1336_s19, 0 }
 0x714   :  { %1340 = shalt.err (%p1545_p0)  }

</bundles_post_ra>
